<compile_context>
chip_gen: v5e
topology: v5e:2x2
jax: 0.10.0
libtpu: 0.0.40
codegen_flags: <defaults>
</compile_context>

<pallas_src>
import functools

import jax
import jax.numpy as jnp
from jax.experimental import pallas as pl
from jax.experimental.pallas import tpu as pltpu

# Layer widths of the autoencoder (encoder then decoder).
ENC_DIMS = [28 * 28, 128, 64, 36, 18, 9]
DEC_DIMS = [9, 18, 36, 64, 128, 28 * 28]

_D = 28 * 28          # 784 (multiple of 8, NOT a multiple of 128 -> full-dim blocks)
_LANE = 128
_SUBLANE = 8


def _round_up(n, m):
    return (n + m - 1) // m * m


def _cdiv(a, b):
    return (a + b - 1) // b


# --------------------------------------------------------------------------- #
# Kernel
# --------------------------------------------------------------------------- #
def _autoencoder_kernel(x_ref, *refs):
    """Fused forward: 10 x (Linear [+ReLU]) ... latent (no act) ... Sigmoid.

    refs = (w1, ..., w10, b_packed, out_ref).
      * wi are lane-padded weights (din_pad, dout_pad); padding is zeros.
      * b_packed is (10, 784) f32; row li holds bias li in its leading cols.
    Activations are cast to the weight dtype right before each dot (bf16
    weights -> bf16 MXU inputs); accumulation is always f32.
    """
    out_ref = refs[-1]
    b_ref = refs[-2]
    w_refs = refs[:-2]

    h = x_ref[...]                                   # (tile_b, 784), input dtype
    n_layers = len(w_refs)                           # 10
    for li in range(n_layers):
        w = w_refs[li][...]
        dout = w.shape[1]
        b = b_ref[li:li + 1, :dout].astype(jnp.float32)          # (1, dout)
        h = jnp.dot(h.astype(w.dtype), w,
                    preferred_element_type=jnp.float32) + b       # f32 accum
        if li == n_layers - 1:
            h = jax.nn.sigmoid(h)        # final decoder layer: Sigmoid
        elif li == 4:
            pass                         # latent layer (dim 9): no activation
        else:
            h = jnp.maximum(h, 0.0)      # ReLU

    out_ref[...] = h.astype(out_ref.dtype)


# --------------------------------------------------------------------------- #
# Parameters
# --------------------------------------------------------------------------- #
def make_params(key, dtype=jnp.float32):
    """Deterministic init (uniform +-1/sqrt(fan_in), like torch default).

    Weights are stored (in_features, out_features) so the kernel computes
    h @ W + b, matching torch.nn.Linear's y = x @ W.T + b with W pre-transposed.
    Returns [w1, b1, ..., w10, b10].
    """
    dims = list(zip(ENC_DIMS[:-1], ENC_DIMS[1:])) + list(zip(DEC_DIMS[:-1], DEC_DIMS[1:]))
    params = []
    for (din, dout) in dims:
        key, kw, kb = jax.random.split(key, 3)
        bound = 1.0 / jnp.sqrt(jnp.float32(din))
        w = jax.random.uniform(kw, (din, dout), jnp.float32, -bound, bound)
        b = jax.random.uniform(kb, (1, dout), jnp.float32, -bound, bound)
        params.append(w.astype(dtype))
        params.append(b.astype(dtype))
    return params


def _pad_dim(d):
    # 784 stays unpadded (block == full array dim); hidden dims -> 128.
    return d if d == _D else _round_up(d, _LANE)


def _pack_params(params):
    """Zero-pad weights' hidden dims to 128 and pack all biases into (10,784) f32."""
    weights = params[0::2]
    biases = params[1::2]

    padded_ws = []
    for w in weights:
        din, dout = w.shape
        din_p, dout_p = _pad_dim(din), _pad_dim(dout)
        padded_ws.append(jnp.pad(w, ((0, din_p - din), (0, dout_p - dout))))

    b_rows = []
    for b in biases:
        b = b.reshape(1, -1).astype(jnp.float32)
        b_rows.append(jnp.pad(b, ((0, 0), (0, _D - b.shape[1]))))
    b_packed = jnp.concatenate(b_rows, axis=0)        # (10, 784) f32

    return padded_ws, b_packed


# --------------------------------------------------------------------------- #
# Wrapper
# --------------------------------------------------------------------------- #
@functools.partial(jax.jit, static_argnames=("tile_b", "vmem_limit_bytes"))
def wikiart_autoencoder_forward(x, params, *, tile_b=512,
                                vmem_limit_bytes=48 * 1024 * 1024):
    """Fused autoencoder forward on x of shape (B, 784) (flattened 28x28 images).

    Output has x's dtype.  Pass bf16 x + bf16 weights for the fast path
    (f32 accumulation happens inside the kernel regardless).
    """
    B, D = x.shape
    assert D == _D

    # ---- batch tile selection -------------------------------------------- #
    # Keep >= 2 grid steps whenever B > 8 so v7x's two TensorCores both get
    # work (batch axis is "parallel"); on v5e/v6e the extra step costs ~0.35us.
    tile_b = min(tile_b, _round_up(_cdiv(B, 2), _SUBLANE))
    tile_b = max(tile_b, _SUBLANE)

    # Limit batch-pad waste to ~12.5% of streamed rows (padded rows are DMA'd
    # and computed then thrown away), but don't shrink tiles below 128.
    B_pad = _round_up(B, tile_b)
    while tile_b > _LANE and (B_pad - B) * 8 > B_pad:
        tile_b = _round_up(tile_b // 2, _SUBLANE)
        B_pad = _round_up(B, tile_b)

    # ---- padding (batch tail only; NO lane padding of the stream) --------- #
    x_p = x if B_pad == B else jnp.pad(x, ((0, B_pad - B), (0, 0)))

    padded_ws, b_packed = _pack_params(params)

    grid = (B_pad // tile_b,)

    # Weights / packed bias: full-array blocks with a constant index_map, so
    # they are DMA'd once and stay resident across all grid steps.
    param_specs = ([pl.BlockSpec(w.shape, lambda i: (0, 0)) for w in padded_ws]
                   + [pl.BlockSpec(b_packed.shape, lambda i: (0, 0))])

    # Advisory cost estimate for XLA's scheduler.
    flops = 2 * B_pad * sum(int(w.shape[0]) * int(w.shape[1]) for w in padded_ws)
    bytes_accessed = (x_p.size * x_p.dtype.itemsize
                      + B_pad * D * x.dtype.itemsize              # output stream
                      + sum(int(w.size) * w.dtype.itemsize for w in padded_ws)
                      + int(b_packed.size) * b_packed.dtype.itemsize)
    cost = pl.CostEstimate(flops=flops,
                           transcendentals=B_pad * D,             # final sigmoid
                           bytes_accessed=bytes_accessed)

    grid_spec = pltpu.PrefetchScalarGridSpec(
        num_scalar_prefetch=0,
        grid=grid,
        in_specs=[pl.BlockSpec((tile_b, D), lambda i: (i, 0))] + param_specs,
        out_specs=pl.BlockSpec((tile_b, D), lambda i: (i, 0)),
    )

    out_p = pl.pallas_call(
        _autoencoder_kernel,
        out_shape=jax.ShapeDtypeStruct((B_pad, D), x.dtype),
        grid_spec=grid_spec,
        compiler_params=pltpu.CompilerParams(
            dimension_semantics=("parallel",),
            vmem_limit_bytes=vmem_limit_bytes),
        cost_estimate=cost,
    )(x_p, *padded_ws, b_packed)

    return out_p if B_pad == B else out_p[:B]


# --------------------------------------------------------------------------- #
# Reference + demo
# --------------------------------------------------------------------------- #
def reference_forward(x, params):
    """Plain-JAX f32 reference for correctness checking (unpadded)."""
    h = x.astype(jnp.float32)
    n_layers = len(params) // 2
    for li in range(n_layers):
        w = params[2 * li].astype(jnp.float32)
        b = params[2 * li + 1].astype(jnp.float32)
        h = h @ w + b
        if li == n_layers - 1:
            h = jax.nn.sigmoid(h)
        elif li == 4:
            pass
        else:
            h = jnp.maximum(h, 0.0)
    return h


if __name__ == "__main__":
    key = jax.random.PRNGKey(0)
    key, kx = jax.random.split(key)

    # Small, deliberately non-multiple-of-tile batch: exercises batch padding.
    B = 10
    x = jax.random.uniform(kx, (B, _D), jnp.float32)
    params = make_params(key)

    ref = reference_forward(x, params)

    # f32 path (tight check).  tile clamps to 8 -> 2 grid steps.
    out = jax.block_until_ready(wikiart_autoencoder_forward(x, params))
    assert out.shape == (B, _D)
    assert jnp.allclose(out, ref, atol=2e-5, rtol=2e-5), "mismatch vs reference"

    # Multi-step grid with no batch padding (exercises the tiling path).
    B2 = 96
    x2 = jax.random.uniform(jax.random.PRNGKey(1), (B2, _D), jnp.float32)
    ref2 = reference_forward(x2, params)
    out2 = jax.block_until_ready(
        wikiart_autoencoder_forward(x2, params, tile_b=32))
    assert jnp.allclose(out2, ref2, atol=2e-5, rtol=2e-5), "mismatch vs reference (tiled)"

    # bf16 weights + bf16 streams (recommended production path); loose tolerance
    # vs. the f32 reference since inputs/weights are quantized to bf16.
    params_bf16 = [p.astype(jnp.bfloat16) for p in params]
    x_bf16 = x.astype(jnp.bfloat16)
    out_bf16 = jax.block_until_ready(
        wikiart_autoencoder_forward(x_bf16, params_bf16))
    assert out_bf16.dtype == jnp.bfloat16
    err = float(jnp.max(jnp.abs(out_bf16.astype(jnp.float32) - ref)))
    assert err < 5e-2, f"bf16 path error too large: {err}"

    print("KERNEL_OK")
</pallas_src>

<mosaic_0001>
module attributes {stable_mosaic.version = 11 : i64} {
  func.func @_autoencoder_kernel(%arg0: i32, %arg1: memref<8x784xf32, #tpu.memory_space<vmem>>, %arg2: memref<784x128xf32, #tpu.memory_space<vmem>>, %arg3: memref<128x128xf32, #tpu.memory_space<vmem>>, %arg4: memref<128x128xf32, #tpu.memory_space<vmem>>, %arg5: memref<128x128xf32, #tpu.memory_space<vmem>>, %arg6: memref<128x128xf32, #tpu.memory_space<vmem>>, %arg7: memref<128x128xf32, #tpu.memory_space<vmem>>, %arg8: memref<128x128xf32, #tpu.memory_space<vmem>>, %arg9: memref<128x128xf32, #tpu.memory_space<vmem>>, %arg10: memref<128x128xf32, #tpu.memory_space<vmem>>, %arg11: memref<128x784xf32, #tpu.memory_space<vmem>>, %arg12: memref<10x784xf32, #tpu.memory_space<vmem>>, %arg13: memref<8x784xf32, #tpu.memory_space<vmem>>) attributes {dimension_semantics = [#tpu.dimension_semantics<parallel>], iteration_bounds = array<i64: 2>, scalar_prefetch = 0 : i64, scratch_operands = 0 : i64, tpu.core_type = #tpu.core_type<tc>, window_params = [{transform_indices = @transform_0, window_bounds = array<i64: 8, 784>}, {pipeline_mode = #tpu.pipeline_mode<synchronous>, transform_indices = @transform_1, window_bounds = array<i64: 784, 128>}, {pipeline_mode = #tpu.pipeline_mode<synchronous>, transform_indices = @transform_2, window_bounds = array<i64: 128, 128>}, {pipeline_mode = #tpu.pipeline_mode<synchronous>, transform_indices = @transform_3, window_bounds = array<i64: 128, 128>}, {pipeline_mode = #tpu.pipeline_mode<synchronous>, transform_indices = @transform_4, window_bounds = array<i64: 128, 128>}, {pipeline_mode = #tpu.pipeline_mode<synchronous>, transform_indices = @transform_5, window_bounds = array<i64: 128, 128>}, {pipeline_mode = #tpu.pipeline_mode<synchronous>, transform_indices = @transform_6, window_bounds = array<i64: 128, 128>}, {pipeline_mode = #tpu.pipeline_mode<synchronous>, transform_indices = @transform_7, window_bounds = array<i64: 128, 128>}, {pipeline_mode = #tpu.pipeline_mode<synchronous>, transform_indices = @transform_8, window_bounds = array<i64: 128, 128>}, {pipeline_mode = #tpu.pipeline_mode<synchronous>, transform_indices = @transform_9, window_bounds = array<i64: 128, 128>}, {pipeline_mode = #tpu.pipeline_mode<synchronous>, transform_indices = @transform_10, window_bounds = array<i64: 128, 784>}, {pipeline_mode = #tpu.pipeline_mode<synchronous>, transform_indices = @transform_11, window_bounds = array<i64: 10, 784>}, {transform_indices = @transform_12, window_bounds = array<i64: 8, 784>}]} {
    %c0 = arith.constant 0 : index
    %c0_0 = arith.constant 0 : index
    %0 = vector.load %arg1[%c0, %c0_0] : memref<8x784xf32, #tpu.memory_space<vmem>>, vector<8x784xf32>
    %c0_1 = arith.constant 0 : index
    %c0_2 = arith.constant 0 : index
    %1 = vector.load %arg2[%c0_1, %c0_2] : memref<784x128xf32, #tpu.memory_space<vmem>>, vector<784x128xf32>
    %c0_3 = arith.constant 0 : index
    %c0_4 = arith.constant 0 : index
    %2 = vector.load %arg12[%c0_3, %c0_4] : memref<10x784xf32, #tpu.memory_space<vmem>>, vector<1x128xf32>
    %cst = arith.constant dense<0.000000e+00> : vector<8x128xf32>
    %3 = tpu.matmul %0, %1, %cst {dimension_numbers = #tpu.dot_dimension_numbers<[1], [0], [0], [1], [0, 0, 1, 1], [], []>} : vector<8x784xf32>, vector<784x128xf32>, vector<8x128xf32> -> vector<8x128xf32>
    %4 = vector.broadcast %2 : vector<1x128xf32> to vector<8x128xf32>
    %5 = arith.addf %3, %4 : vector<8x128xf32>
    %cst_5 = arith.constant 0.000000e+00 : f32
    %6 = vector.broadcast %cst_5 : f32 to vector<8x128xf32>
    %7 = arith.maximumf %5, %6 : vector<8x128xf32>
    %c0_6 = arith.constant 0 : index
    %c0_7 = arith.constant 0 : index
    %8 = vector.load %arg3[%c0_6, %c0_7] : memref<128x128xf32, #tpu.memory_space<vmem>>, vector<128x128xf32>
    %c1 = arith.constant 1 : index
    %c0_8 = arith.constant 0 : index
    %9 = vector.load %arg12[%c1, %c0_8] : memref<10x784xf32, #tpu.memory_space<vmem>>, vector<1x128xf32>
    %cst_9 = arith.constant dense<0.000000e+00> : vector<8x128xf32>
    %10 = tpu.matmul %7, %8, %cst_9 {dimension_numbers = #tpu.dot_dimension_numbers<[1], [0], [0], [1], [0, 0, 1, 1], [], []>} : vector<8x128xf32>, vector<128x128xf32>, vector<8x128xf32> -> vector<8x128xf32>
    %11 = vector.broadcast %9 : vector<1x128xf32> to vector<8x128xf32>
    %12 = arith.addf %10, %11 : vector<8x128xf32>
    %cst_10 = arith.constant 0.000000e+00 : f32
    %13 = vector.broadcast %cst_10 : f32 to vector<8x128xf32>
    %14 = arith.maximumf %12, %13 : vector<8x128xf32>
    %c0_11 = arith.constant 0 : index
    %c0_12 = arith.constant 0 : index
    %15 = vector.load %arg4[%c0_11, %c0_12] : memref<128x128xf32, #tpu.memory_space<vmem>>, vector<128x128xf32>
    %c2 = arith.constant 2 : index
    %c0_13 = arith.constant 0 : index
    %16 = vector.load %arg12[%c2, %c0_13] : memref<10x784xf32, #tpu.memory_space<vmem>>, vector<1x128xf32>
    %cst_14 = arith.constant dense<0.000000e+00> : vector<8x128xf32>
    %17 = tpu.matmul %14, %15, %cst_14 {dimension_numbers = #tpu.dot_dimension_numbers<[1], [0], [0], [1], [0, 0, 1, 1], [], []>} : vector<8x128xf32>, vector<128x128xf32>, vector<8x128xf32> -> vector<8x128xf32>
    %18 = vector.broadcast %16 : vector<1x128xf32> to vector<8x128xf32>
    %19 = arith.addf %17, %18 : vector<8x128xf32>
    %cst_15 = arith.constant 0.000000e+00 : f32
    %20 = vector.broadcast %cst_15 : f32 to vector<8x128xf32>
    %21 = arith.maximumf %19, %20 : vector<8x128xf32>
    %c0_16 = arith.constant 0 : index
    %c0_17 = arith.constant 0 : index
    %22 = vector.load %arg5[%c0_16, %c0_17] : memref<128x128xf32, #tpu.memory_space<vmem>>, vector<128x128xf32>
    %c3 = arith.constant 3 : index
    %c0_18 = arith.constant 0 : index
    %23 = vector.load %arg12[%c3, %c0_18] : memref<10x784xf32, #tpu.memory_space<vmem>>, vector<1x128xf32>
    %cst_19 = arith.constant dense<0.000000e+00> : vector<8x128xf32>
    %24 = tpu.matmul %21, %22, %cst_19 {dimension_numbers = #tpu.dot_dimension_numbers<[1], [0], [0], [1], [0, 0, 1, 1], [], []>} : vector<8x128xf32>, vector<128x128xf32>, vector<8x128xf32> -> vector<8x128xf32>
    %25 = vector.broadcast %23 : vector<1x128xf32> to vector<8x128xf32>
    %26 = arith.addf %24, %25 : vector<8x128xf32>
    %cst_20 = arith.constant 0.000000e+00 : f32
    %27 = vector.broadcast %cst_20 : f32 to vector<8x128xf32>
    %28 = arith.maximumf %26, %27 : vector<8x128xf32>
    %c0_21 = arith.constant 0 : index
    %c0_22 = arith.constant 0 : index
    %29 = vector.load %arg6[%c0_21, %c0_22] : memref<128x128xf32, #tpu.memory_space<vmem>>, vector<128x128xf32>
    %c4 = arith.constant 4 : index
    %c0_23 = arith.constant 0 : index
    %30 = vector.load %arg12[%c4, %c0_23] : memref<10x784xf32, #tpu.memory_space<vmem>>, vector<1x128xf32>
    %cst_24 = arith.constant dense<0.000000e+00> : vector<8x128xf32>
    %31 = tpu.matmul %28, %29, %cst_24 {dimension_numbers = #tpu.dot_dimension_numbers<[1], [0], [0], [1], [0, 0, 1, 1], [], []>} : vector<8x128xf32>, vector<128x128xf32>, vector<8x128xf32> -> vector<8x128xf32>
    %32 = vector.broadcast %30 : vector<1x128xf32> to vector<8x128xf32>
    %33 = arith.addf %31, %32 : vector<8x128xf32>
    %c0_25 = arith.constant 0 : index
    %c0_26 = arith.constant 0 : index
    %34 = vector.load %arg7[%c0_25, %c0_26] : memref<128x128xf32, #tpu.memory_space<vmem>>, vector<128x128xf32>
    %c5 = arith.constant 5 : index
    %c0_27 = arith.constant 0 : index
    %35 = vector.load %arg12[%c5, %c0_27] : memref<10x784xf32, #tpu.memory_space<vmem>>, vector<1x128xf32>
    %cst_28 = arith.constant dense<0.000000e+00> : vector<8x128xf32>
    %36 = tpu.matmul %33, %34, %cst_28 {dimension_numbers = #tpu.dot_dimension_numbers<[1], [0], [0], [1], [0, 0, 1, 1], [], []>} : vector<8x128xf32>, vector<128x128xf32>, vector<8x128xf32> -> vector<8x128xf32>
    %37 = vector.broadcast %35 : vector<1x128xf32> to vector<8x128xf32>
    %38 = arith.addf %36, %37 : vector<8x128xf32>
    %cst_29 = arith.constant 0.000000e+00 : f32
    %39 = vector.broadcast %cst_29 : f32 to vector<8x128xf32>
    %40 = arith.maximumf %38, %39 : vector<8x128xf32>
    %c0_30 = arith.constant 0 : index
    %c0_31 = arith.constant 0 : index
    %41 = vector.load %arg8[%c0_30, %c0_31] : memref<128x128xf32, #tpu.memory_space<vmem>>, vector<128x128xf32>
    %c6 = arith.constant 6 : index
    %c0_32 = arith.constant 0 : index
    %42 = vector.load %arg12[%c6, %c0_32] : memref<10x784xf32, #tpu.memory_space<vmem>>, vector<1x128xf32>
    %cst_33 = arith.constant dense<0.000000e+00> : vector<8x128xf32>
    %43 = tpu.matmul %40, %41, %cst_33 {dimension_numbers = #tpu.dot_dimension_numbers<[1], [0], [0], [1], [0, 0, 1, 1], [], []>} : vector<8x128xf32>, vector<128x128xf32>, vector<8x128xf32> -> vector<8x128xf32>
    %44 = vector.broadcast %42 : vector<1x128xf32> to vector<8x128xf32>
    %45 = arith.addf %43, %44 : vector<8x128xf32>
    %cst_34 = arith.constant 0.000000e+00 : f32
    %46 = vector.broadcast %cst_34 : f32 to vector<8x128xf32>
    %47 = arith.maximumf %45, %46 : vector<8x128xf32>
    %c0_35 = arith.constant 0 : index
    %c0_36 = arith.constant 0 : index
    %48 = vector.load %arg9[%c0_35, %c0_36] : memref<128x128xf32, #tpu.memory_space<vmem>>, vector<128x128xf32>
    %c7 = arith.constant 7 : index
    %c0_37 = arith.constant 0 : index
    %49 = vector.load %arg12[%c7, %c0_37] : memref<10x784xf32, #tpu.memory_space<vmem>>, vector<1x128xf32>
    %cst_38 = arith.constant dense<0.000000e+00> : vector<8x128xf32>
    %50 = tpu.matmul %47, %48, %cst_38 {dimension_numbers = #tpu.dot_dimension_numbers<[1], [0], [0], [1], [0, 0, 1, 1], [], []>} : vector<8x128xf32>, vector<128x128xf32>, vector<8x128xf32> -> vector<8x128xf32>
    %51 = vector.broadcast %49 : vector<1x128xf32> to vector<8x128xf32>
    %52 = arith.addf %50, %51 : vector<8x128xf32>
    %cst_39 = arith.constant 0.000000e+00 : f32
    %53 = vector.broadcast %cst_39 : f32 to vector<8x128xf32>
    %54 = arith.maximumf %52, %53 : vector<8x128xf32>
    %c0_40 = arith.constant 0 : index
    %c0_41 = arith.constant 0 : index
    %55 = vector.load %arg10[%c0_40, %c0_41] : memref<128x128xf32, #tpu.memory_space<vmem>>, vector<128x128xf32>
    %c8 = arith.constant 8 : index
    %c0_42 = arith.constant 0 : index
    %56 = vector.load %arg12[%c8, %c0_42] : memref<10x784xf32, #tpu.memory_space<vmem>>, vector<1x128xf32>
    %cst_43 = arith.constant dense<0.000000e+00> : vector<8x128xf32>
    %57 = tpu.matmul %54, %55, %cst_43 {dimension_numbers = #tpu.dot_dimension_numbers<[1], [0], [0], [1], [0, 0, 1, 1], [], []>} : vector<8x128xf32>, vector<128x128xf32>, vector<8x128xf32> -> vector<8x128xf32>
    %58 = vector.broadcast %56 : vector<1x128xf32> to vector<8x128xf32>
    %59 = arith.addf %57, %58 : vector<8x128xf32>
    %cst_44 = arith.constant 0.000000e+00 : f32
    %60 = vector.broadcast %cst_44 : f32 to vector<8x128xf32>
    %61 = arith.maximumf %59, %60 : vector<8x128xf32>
    %c0_45 = arith.constant 0 : index
    %c0_46 = arith.constant 0 : index
    %62 = vector.load %arg11[%c0_45, %c0_46] : memref<128x784xf32, #tpu.memory_space<vmem>>, vector<128x784xf32>
    %c9 = arith.constant 9 : index
    %c0_47 = arith.constant 0 : index
    %63 = vector.load %arg12[%c9, %c0_47] : memref<10x784xf32, #tpu.memory_space<vmem>>, vector<1x784xf32>
    %cst_48 = arith.constant dense<0.000000e+00> : vector<8x784xf32>
    %64 = tpu.matmul %61, %62, %cst_48 {dimension_numbers = #tpu.dot_dimension_numbers<[1], [0], [0], [1], [0, 0, 1, 1], [], []>} : vector<8x128xf32>, vector<128x784xf32>, vector<8x784xf32> -> vector<8x784xf32>
    %65 = vector.broadcast %63 : vector<1x784xf32> to vector<8x784xf32>
    %66 = arith.addf %64, %65 : vector<8x784xf32>
    %67 = arith.negf %66 : vector<8x784xf32>
    %68 = math.exp %67 : vector<8x784xf32>
    %cst_49 = arith.constant 1.000000e+00 : f32
    %69 = vector.broadcast %cst_49 : f32 to vector<8x784xf32>
    %70 = arith.addf %69, %68 : vector<8x784xf32>
    %71 = arith.divf %69, %70 : vector<8x784xf32>
    %c0_50 = arith.constant 0 : index
    %c0_51 = arith.constant 0 : index
    %72 = vector.load %arg13[%c0_50, %c0_51] : memref<8x784xf32, #tpu.memory_space<vmem>>, vector<8x784xf32>
    tpu.vector_store %arg13[%c0_50, %c0_51], %71 {strides = array<i32>} : memref<8x784xf32, #tpu.memory_space<vmem>>, vector<8x784xf32>,
    return
  }
  func.func @transform_0(%arg0: i32) -> (i32, i32) {
    %c0_i32 = arith.constant 0 : i32
    %c0_i32_0 = arith.constant 0 : i32
    return %arg0, %c0_i32 : i32, i32
  }
  func.func @transform_1(%arg0: i32) -> (i32, i32) {
    %c0_i32 = arith.constant 0 : i32
    %c0_i32_0 = arith.constant 0 : i32
    %c0_i32_1 = arith.constant 0 : i32
    return %c0_i32, %c0_i32_0 : i32, i32
  }
  func.func @transform_2(%arg0: i32) -> (i32, i32) {
    %c0_i32 = arith.constant 0 : i32
    %c0_i32_0 = arith.constant 0 : i32
    %c0_i32_1 = arith.constant 0 : i32
    return %c0_i32, %c0_i32_0 : i32, i32
  }
  func.func @transform_3(%arg0: i32) -> (i32, i32) {
    %c0_i32 = arith.constant 0 : i32
    %c0_i32_0 = arith.constant 0 : i32
    %c0_i32_1 = arith.constant 0 : i32
    return %c0_i32, %c0_i32_0 : i32, i32
  }
  func.func @transform_4(%arg0: i32) -> (i32, i32) {
    %c0_i32 = arith.constant 0 : i32
    %c0_i32_0 = arith.constant 0 : i32
    %c0_i32_1 = arith.constant 0 : i32
    return %c0_i32, %c0_i32_0 : i32, i32
  }
  func.func @transform_5(%arg0: i32) -> (i32, i32) {
    %c0_i32 = arith.constant 0 : i32
    %c0_i32_0 = arith.constant 0 : i32
    %c0_i32_1 = arith.constant 0 : i32
    return %c0_i32, %c0_i32_0 : i32, i32
  }
  func.func @transform_6(%arg0: i32) -> (i32, i32) {
    %c0_i32 = arith.constant 0 : i32
    %c0_i32_0 = arith.constant 0 : i32
    %c0_i32_1 = arith.constant 0 : i32
    return %c0_i32, %c0_i32_0 : i32, i32
  }
  func.func @transform_7(%arg0: i32) -> (i32, i32) {
    %c0_i32 = arith.constant 0 : i32
    %c0_i32_0 = arith.constant 0 : i32
    %c0_i32_1 = arith.constant 0 : i32
    return %c0_i32, %c0_i32_0 : i32, i32
  }
  func.func @transform_8(%arg0: i32) -> (i32, i32) {
    %c0_i32 = arith.constant 0 : i32
    %c0_i32_0 = arith.constant 0 : i32
    %c0_i32_1 = arith.constant 0 : i32
    return %c0_i32, %c0_i32_0 : i32, i32
  }
  func.func @transform_9(%arg0: i32) -> (i32, i32) {
    %c0_i32 = arith.constant 0 : i32
    %c0_i32_0 = arith.constant 0 : i32
    %c0_i32_1 = arith.constant 0 : i32
    return %c0_i32, %c0_i32_0 : i32, i32
  }
  func.func @transform_10(%arg0: i32) -> (i32, i32) {
    %c0_i32 = arith.constant 0 : i32
    %c0_i32_0 = arith.constant 0 : i32
    %c0_i32_1 = arith.constant 0 : i32
    return %c0_i32, %c0_i32_0 : i32, i32
  }
  func.func @transform_11(%arg0: i32) -> (i32, i32) {
    %c0_i32 = arith.constant 0 : i32
    %c0_i32_0 = arith.constant 0 : i32
    %c0_i32_1 = arith.constant 0 : i32
    return %c0_i32, %c0_i32_0 : i32, i32
  }
  func.func @transform_12(%arg0: i32) -> (i32, i32) {
    %c0_i32 = arith.constant 0 : i32
    %c0_i32_0 = arith.constant 0 : i32
    return %arg0, %c0_i32 : i32, i32
  }
}

</mosaic_0001>

<bundles_post_ra>
// kernel: wikiart_autoencoder_forward.1
= control target key start
LH: loop header
LB: loop body
LE: loop exit
PB: predicated region body
PF: predicated region fallthrough
CT: control target
= control target key end

     0   :  { %17 = vsyncpa [#allocation3], 0  ;;  %s2885_s0 = inlined_call_operand.vmem [shape: f32[16,784], index: 0, kind: input, shape index: {}]   ;;  %s2886_s1 = inlined_call_operand.vmem [shape: f32[784,128], index: 1, kind: input, shape index: {}]   ;;  %s2887_s2 = inlined_call_operand.vmem [shape: f32[128,128], index: 2, kind: input, shape index: {}]   ;;  %s2888_s3 = inlined_call_operand.vmem [shape: f32[128,128], index: 3, kind: input, shape index: {}]   ;;  %s2889_s4 = inlined_call_operand.vmem [shape: f32[128,128], index: 4, kind: input, shape index: {}]   ;;  %s2890_s5 = inlined_call_operand.vmem [shape: f32[128,128], index: 5, kind: input, shape index: {}]   ;;  %s2891_s6 = inlined_call_operand.vmem [shape: f32[128,128], index: 6, kind: input, shape index: {}]   ;;  %s2892_s7 = inlined_call_operand.vmem [shape: f32[128,128], index: 7, kind: input, shape index: {}]   ;;  %s2893_s8 = inlined_call_operand.vmem [shape: f32[128,128], index: 8, kind: input, shape index: {}]   ;;  %s2894_s9 = inlined_call_operand.vmem [shape: f32[128,128], index: 9, kind: input, shape index: {}]   ;;  %s2895_s10 = inlined_call_operand.vmem [shape: f32[128,784], index: 10, kind: input, shape index: {}]   ;;  %s2896_s11 = inlined_call_operand.vmem [shape: f32[10,784], index: 11, kind: input, shape index: {}]   ;;  %s2897_s12 = inlined_call_operand.hbm [shape: f32[16,784], index: 12, kind: output, shape index: {}]  }
   0x1   :  { %19 = vsyncpa [#allocation3 + $0x1], 0  ;;  %s1670_s21 = smov 0   ;;  %s1672_s22 = smov 0  }
   0x2   :  { %s1674_s23 = smov 0   ;;  %s1676_s24 = smov 0  }
   0x3 LB: > { %2901 = sst [smem:[#allocation5_spill]] %s1599_s23  ;;  %s1691_s25 = sadd.s32 4294967295, %s1603_s24   ;;  %s1603_s24 = sphi %s1676_s24, %s2910_s24   ;;  %s1599_s23 = sphi %s1674_s23, %s2912_s23   ;;  %s1595_s22 = sphi %s1672_s22, %s2914_s22   ;;  %s1591_s21 = sphi %s1670_s21, %s2913_s21  }
   0x4   : > { %s1453_s26 = sadd.s32 4294967294, %s1603_s24   ;;  %s1695_s27 = sadd.s32 1, %s1603_s24  }
   0x5   : > { %2902 = sst [smem:[#allocation6_spill]] %s1695_s27  ;;  %s289_s28 = sadd.s32 1, %s1599_s23 }
   0x6   : > { %s286_s29 = ssub.s32 %s1603_s24, %s1695_s27  ;;  %p299_p0 = scmp.ne.s32.totalorder %s1599_s23, %s1595_s22 }
   0x7   : > { %p287_p1 = scmp.eq.s32.totalorder %s286_s29, 0  ;;  %p300_p2 = scmp.eq.s32.totalorder %s1691_s25, 1 }
   0x8   : > { %p305_p3 = scmp.ne.s32.totalorder %s1595_s22, %s1591_s21  ;;  %p306_p4 = scmp.eq.s32.totalorder %s1453_s26, 1 }
   0x9   : > { %s1706_s30 = scalar_select %p287_p1, %s1599_s23, %s289_s28  }
   0xa   : > { %p1708_p5 = por %p300_p2, %p299_p0  ;;  %p1712_p6 = por %p306_p4, %p305_p3 }
   0xb   : > { %2903 = sst [smem:[#allocation7_spill]] %s1706_s30  ;;  %p1456_p7 = scmp.ge.s32.totalorder %s1603_s24, 1 }
   0xc   : > { %p365_p8 = scmp.lt.s32.totalorder %s1603_s24, 3 }
   0xe   : > { %p366_p9 = pnand %p1456_p7, %p365_p8 }
   0xf   : > { %p407_p10 = scmp.lt.s32.totalorder (!%p366_p9), %s1691_s25, 1  ;;  %s404_s17 = sand.u32 (!%p366_p9), 1, %s1595_s22  }
  0x10   : > { %369 = sbr.rel (%p366_p9) target bundleno = 1459 (0x5b3), region = 68  ;;  %s1378_s23 = scalar_lea.sflag (!%p366_p9), [#allocation3], %s404_s17 }
  0x11   : > { %s2796_s19 = smul.u32 (!%p366_p9), 56, %s404_s17 }
  0x12   : > { %s1473_s28 = smul.u32 (!%p366_p9), 56, %s1691_s25 }
  0x13   : > { %s2820_s20 = scalar_lea.vmem (!%p366_p9), [#allocation2], %s2796_s19 }
  0x15   : > { %v434_v0 = vld [vmem:[%s2886_s1 + $0x78] sm:$0xff]  ;;  %v433_v1 = vld [vmem:[%s2886_s1 + $0x70] sm:$0xff]  ;;  %v432_v4 = vld [vmem:[%s2886_s1 + $0x68] sm:$0xff]  ;;  %s1881_s26 = scalar_select %p407_p10, %s1691_s25, 1  ;;  %vm518_vm0 = vcmask 130048  }
  0x16   : > { %v450_v2 = vld [vmem:[%s2886_s1 + $0xf8] sm:$0xff]  ;;  %522 = vmatpush.msra.mxu0 %v434_v0  ;;  %v449_v3 = vld [vmem:[%s2886_s1 + $0xf0] sm:$0xff]  ;;  %v448_v5 = vld [vmem:[%s2886_s1 + $0xe8] sm:$0xff]  ;;  %s1389_s25 = scalar_lea.hbm %s2897_s12, %s1473_s28  ;;  %s1561_s28 = scalar_lea.hbm %s2897_s12, 112 }
  0x17   : > { %542 = vmatpush.msra.mxu1 %v450_v2  ;;  %v431_v6 = vld [vmem:[%s2886_s1 + $0x60] sm:$0xff]  ;;  %v430_v8 = vld [vmem:[%s2886_s1 + $0x58] sm:$0xff]  ;;  %v429_v10 = vld [vmem:[%s2886_s1 + $0x50] sm:$0xff]  ;;  %s1472_s18 = smul.u32 56, %s1881_s26  ;;  %s1393_s29 = sshll.u32 %s1389_s25, 4  ;;  %s1394_s29 = int_to_ptr.hbm [resolvable:$true] %s1393_s29 }
  0x18   : > { %523 = vmatpush.msra.mxu0 %v433_v1  ;;  %v447_v7 = vld [vmem:[%s2886_s1 + $0xe0] sm:$0xff]  ;;  %v446_v9 = vld [vmem:[%s2886_s1 + $0xd8] sm:$0xff]  ;;  %v445_v12 = vld [vmem:[%s2886_s1 + $0xd0] sm:$0xff]  ;;  %s1555_s26 = sshra.s32 %s1394_s29, 4  ;;  %s1556_s26 = int_to_ptr.hbm [resolvable:$true] %s1555_s26 }
  0x19   : > { %543 = vmatpush.msra.mxu1 %v449_v3  ;;  %v466_v11 = vld [vmem:[%s2886_s1 + $0x178] sm:$0xff]  ;;  %v465_v13 = vld [vmem:[%s2886_s1 + $0x170] sm:$0xff]  ;;  %v464_v15 = vld [vmem:[%s2886_s1 + $0x168] sm:$0xff]  ;;  %s1935_s15 = scalar_lea.vmem %s2885_s0, %s1472_s18  ;;  %s1391_s18 = sshll.u32 %s2820_s20, 4  ;;  %s1392_s18 = int_to_ptr.vmem [resolvable:$true] %s1391_s18 }
  0x1a   : > { %524 = vmatpush.msra.mxu0 %v432_v4  ;;  %562 = vmatpush.msra.mxu2 %v466_v11  ;;  %v482_v14 = vld [vmem:[%s2886_s1 + $0x1f8] sm:$0xff]  ;;  %v481_v16 = vld [vmem:[%s2886_s1 + $0x1f0] sm:$0xff]  ;;  %v428_v17 = vld [vmem:[%s2886_s1 + $0x48] sm:$0xff]  ;;  %p1562_p0 = scmp.lt.s32.totalorder %s1556_s26, %s2897_s12 }
  0x1b   : > { %544 = vmatpush.msra.mxu1 %v448_v5  ;;  %v444_v18 = vld [vmem:[%s2886_s1 + $0xc8] sm:$0xff]  ;;  %582 = vmatpush.msra.mxu3 %v482_v14  ;;  %v463_v19 = vld [vmem:[%s2886_s1 + $0x160] sm:$0xff]  ;;  %v462_v23 = vld [vmem:[%s2886_s1 + $0x158] sm:$0xff] }
  0x1c   : > { %525 = vmatpush.msra.mxu0 %v431_v6  ;;  %563 = vmatpush.msra.mxu2 %v465_v13  ;;  %v480_v20 = vld [vmem:[%s2886_s1 + $0x1e8] sm:$0xff]  ;;  %v427_v21 = vld [vmem:[%s2886_s1 + $0x40] sm:$0xff]  ;;  %v426_v25 = vld [vmem:[%s2886_s1 + $0x38] sm:$0xff] }
  0x1d   : > { %545 = vmatpush.msra.mxu1 %v447_v7  ;;  %v443_v22 = vld [vmem:[%s2886_s1 + $0xc0] sm:$0xff]  ;;  %583 = vmatpush.msra.mxu3 %v481_v16  ;;  %v442_v26 = vld [vmem:[%s2886_s1 + $0xb8] sm:$0xff]  ;;  %v461_v27 = vld [vmem:[%s2886_s1 + $0x150] sm:$0xff] }
  0x1e   : > { %526 = vmatpush.msra.mxu0 %v430_v8  ;;  %564 = vmatpush.msra.mxu2 %v464_v15  ;;  %v479_v24 = vld [vmem:[%s2886_s1 + $0x1e0] sm:$0xff]  ;;  %v478_v28 = vld [vmem:[%s2886_s1 + $0x1d8] sm:$0xff]  ;;  %v425_v29 = vld [vmem:[%s2886_s1 + $0x30] sm:$0xff] }
  0x1f   : > { %546 = vmatpush.msra.mxu1 %v446_v9  ;;  %584 = vmatpush.msra.mxu3 %v480_v20  ;;  %v441_v30 = vld [vmem:[%s2886_s1 + $0xb0] sm:$0xff]  ;;  %v460_v31 = vld [vmem:[%s2886_s1 + $0x148] sm:$0xff]  ;;  %v459_v35 = vld [vmem:[%s2886_s1 + $0x140] sm:$0xff] }
  0x20   : > { %527 = vmatpush.msra.mxu0 %v429_v10  ;;  %565 = vmatpush.msra.mxu2 %v463_v19  ;;  %v477_v32 = vld [vmem:[%s2886_s1 + $0x1d0] sm:$0xff]  ;;  %v424_v33 = vld [vmem:[%s2886_s1 + $0x28] sm:$0xff]  ;;  %v423_v37 = vld [vmem:[%s2886_s1 + $0x20] sm:$0xff] }
  0x21   : > { %547 = vmatpush.msra.mxu1 %v445_v12  ;;  %585 = vmatpush.msra.mxu3 %v479_v24  ;;  %v440_v34 = vld [vmem:[%s2886_s1 + $0xa8] sm:$0xff]  ;;  %v439_v38 = vld [vmem:[%s2886_s1 + $0xa0] sm:$0xff]  ;;  %v458_v39 = vld [vmem:[%s2886_s1 + $0x138] sm:$0xff] }
  0x22   : > { %528 = vmatpush.msra.mxu0 %v428_v17  ;;  %566 = vmatpush.msra.mxu2 %v462_v23  ;;  %v476_v36 = vld [vmem:[%s2886_s1 + $0x1c8] sm:$0xff]  ;;  %v475_v40 = vld [vmem:[%s2886_s1 + $0x1c0] sm:$0xff]  ;;  %v422_v41 = vld [vmem:[%s2886_s1 + $0x18] sm:$0xff] }
  0x23   : > { %548 = vmatpush.msra.mxu1 %v444_v18  ;;  %586 = vmatpush.msra.mxu3 %v478_v28  ;;  %v438_v42 = vld [vmem:[%s2886_s1 + $0x98] sm:$0xff]  ;;  %v457_v43 = vld [vmem:[%s2886_s1 + $0x130] sm:$0xff]  ;;  %v456_v47 = vld [vmem:[%s2886_s1 + $0x128] sm:$0xff] }
  0x24   : > { %529 = vmatpush.msra.mxu0 %v427_v21  ;;  %567 = vmatpush.msra.mxu2 %v461_v27  ;;  %v474_v44 = vld [vmem:[%s2886_s1 + $0x1b8] sm:$0xff]  ;;  %v421_v45 = vld [vmem:[%s2886_s1 + $0x10] sm:$0xff]  ;;  %v420_v49 = vld [vmem:[%s2886_s1 + $0x8] sm:$0xff] }
  0x25   : > { %549 = vmatpush.msra.mxu1 %v443_v22  ;;  %587 = vmatpush.msra.mxu3 %v477_v32  ;;  %v437_v46 = vld [vmem:[%s2886_s1 + $0x90] sm:$0xff]  ;;  %v436_v50 = vld [vmem:[%s2886_s1 + $0x88] sm:$0xff]  ;;  %v455_v51 = vld [vmem:[%s2886_s1 + $0x120] sm:$0xff] }
  0x26   : > { %530 = vmatpush.msra.mxu0 %v426_v25  ;;  %568 = vmatpush.msra.mxu2 %v460_v31  ;;  %v473_v48 = vld [vmem:[%s2886_s1 + $0x1b0] sm:$0xff]  ;;  %v472_v52 = vld [vmem:[%s2886_s1 + $0x1a8] sm:$0xff]  ;;  %v419_v53 = vld [vmem:[%s2886_s1] sm:$0xff] }
  0x27   : > { %550 = vmatpush.msra.mxu1 %v442_v26  ;;  %588 = vmatpush.msra.mxu3 %v476_v36  ;;  %v435_v54 = vld [vmem:[%s2886_s1 + $0x80] sm:$0xff]  ;;  %v498_v55 = vld [vmem:[%s2886_s1 + $0x278] sm:$0xff]  ;;  %v497_v59 = vld [vmem:[%s2886_s1 + $0x270] sm:$0xff] }
  0x28   : > { %531 = vmatpush.msra.mxu0 %v425_v29  ;;  %569 = vmatpush.msra.mxu2 %v459_v35  ;;  %v514_v56 = vld [vmem:[%s2886_s1 + $0x2f8] sm:$0xff]  ;;  %v471_v58 = vld [vmem:[%s2886_s1 + $0x1a0] sm:$0xff]  ;;  %v513_v60 = vld [vmem:[%s2886_s1 + $0x2f0] sm:$0xff] }
  0x29   : > { %551 = vmatpush.msra.mxu1 %v441_v30  ;;  %589 = vmatpush.msra.mxu3 %v475_v40  ;;  %v454_v57 = vld [vmem:[%s2886_s1 + $0x118] sm:$0xff]  ;;  %v453_v61 = vld [vmem:[%s2886_s1 + $0x110] sm:$0xff]  ;;  %v496_v63 = vld [vmem:[%s2886_s1 + $0x268] sm:$0xff] }
  0x2a   : > { %532 = vmatpush.msra.mxu0 %v424_v33  ;;  %570 = vmatpush.msra.mxu2 %v458_v39  ;;  %v470_v62 = vld [vmem:[%s2886_s1 + $0x198] sm:$0xff]  ;;  %v512_v0 = vld [vmem:[%s2886_s1 + $0x2e8] sm:$0xff]  ;;  %v469_v2 = vld [vmem:[%s2886_s1 + $0x190] sm:$0xff] }
  0x2b   : > { %552 = vmatpush.msra.mxu1 %v440_v34  ;;  %590 = vmatpush.msra.mxu3 %v474_v44  ;;  %v452_v1 = vld [vmem:[%s2886_s1 + $0x108] sm:$0xff]  ;;  %v495_v3 = vld [vmem:[%s2886_s1 + $0x260] sm:$0xff]  ;;  %v494_v7 = vld [vmem:[%s2886_s1 + $0x258] sm:$0xff] }
  0x2c   : > { %533 = vmatpush.msra.mxu0 %v423_v37  ;;  %571 = vmatpush.msra.mxu2 %v457_v43  ;;  %v511_v4 = vld [vmem:[%s2886_s1 + $0x2e0] sm:$0xff]  ;;  %v468_v6 = vld [vmem:[%s2886_s1 + $0x188] sm:$0xff]  ;;  %v510_v8 = vld [vmem:[%s2886_s1 + $0x2d8] sm:$0xff] }
  0x2d   : > { %553 = vmatpush.msra.mxu1 %v439_v38  ;;  %591 = vmatpush.msra.mxu3 %v473_v48  ;;  %v451_v5 = vld [vmem:[%s2886_s1 + $0x100] sm:$0xff]  ;;  %v414_v9 = vld [vmem:[%s1935_s15 + $0x10] sm:$0xff]  ;;  %v516_v13 = vld [vmem:[%s2886_s1 + $0x308] sm:$0xff] }
  0x2e   : > { %534 = vmatpush.msra.mxu0 %v422_v41  ;;  %572 = vmatpush.msra.mxu2 %v456_v47  ;;  %v467_v10 = vld [vmem:[%s2886_s1 + $0x180] sm:$0xff]  ;;  %v493_v11 = vld [vmem:[%s2886_s1 + $0x250] sm:$0xff]  ;;  %v492_v15 = vld [vmem:[%s2886_s1 + $0x248] sm:$0xff] }
  0x2f   : > { %554 = vmatpush.msra.mxu1 %v438_v42  ;;  %592 = vmatpush.msra.mxu3 %v472_v52  ;;  %v509_v12 = vld [vmem:[%s2886_s1 + $0x2d0] sm:$0xff]  ;;  %v412_v14 = vld [vmem:[%s1935_s15] sm:$0xff]  ;;  %v508_v16 = vld [vmem:[%s2886_s1 + $0x2c8] sm:$0xff] }
  0x30   : > { %535 = vmatpush.msra.mxu0 %v421_v45  ;;  %573 = vmatpush.msra.mxu2 %v455_v51  ;;  %v415_v17 = vld [vmem:[%s1935_s15 + $0x18] sm:$0xff]  ;;  %v413_v18 = vld [vmem:[%s1935_s15 + $0x8] sm:$0xff]  ;;  %v491_v19 = vld [vmem:[%s2886_s1 + $0x240] sm:$0xff] }
  0x31   : > { %555 = vmatpush.msra.mxu1 %v437_v46  ;;  %593 = vmatpush.msra.mxu3 %v471_v58  ;;  %v507_v20 = vld [vmem:[%s2886_s1 + $0x2c0] sm:$0xff]  ;;  %v678_v22 = vld [vmem:[%s2887_s2 + $0x78] sm:$0xff]  ;;  %v418_v25 = vld [vmem:[%s1935_s15 + $0x30] sm:$0xff] }
  0x32   : > { %536 = vmatpush.msra.mxu0 %v420_v49  ;;  %574 = vmatpush.msra.mxu2 %v454_v57  ;;  %v515_v21 = vld [vmem:[%s2886_s1 + $0x300] sm:$0xff]  ;;  %v490_v23 = vld [vmem:[%s2886_s1 + $0x238] sm:$0xff]  ;;  %v677_v26 = vld [vmem:[%s2887_s2 + $0x70] sm:$0xff] }
  0x33   : > { %556 = vmatpush.msra.mxu1 %v436_v50  ;;  %594 = vmatpush.msra.mxu3 %v470_v62  ;;  %v506_v24 = vld [vmem:[%s2886_s1 + $0x2b8] sm:$0xff]  ;;  %v489_v27 = vld [vmem:[%s2886_s1 + $0x230] sm:$0xff]  ;;  %v676_v29 = vld [vmem:[%s2887_s2 + $0x68] sm:$0xff] }
  0x34   : > { %537 = vmatpush.msra.mxu0 %v419_v53  ;;  %575 = vmatpush.msra.mxu2 %v453_v61  ;;  %v505_v28 = vld [vmem:[%s2886_s1 + $0x2b0] sm:$0xff]  ;;  %v488_v30 = vld [vmem:[%s2886_s1 + $0x228] sm:$0xff]  ;;  %v675_v32 = vld [vmem:[%s2887_s2 + $0x60] sm:$0xff] }
  0x35   : > { %557 = vmatpush.msra.mxu1 %v435_v54  ;;  %595 = vmatpush.msra.mxu3 %v469_v2  ;;  %v504_v31 = vld [vmem:[%s2886_s1 + $0x2a8] sm:$0xff]  ;;  %v487_v33 = vld [vmem:[%s2886_s1 + $0x220] sm:$0xff]  ;;  %v674_v35 = vld [vmem:[%s2887_s2 + $0x58] sm:$0xff] }
  0x36   : > { %602 = vmatpush.msrb.mxu0 %v498_v55  ;;  %576 = vmatpush.msra.mxu2 %v452_v1  ;;  %v503_v34 = vld [vmem:[%s2886_s1 + $0x2a0] sm:$0xff]  ;;  %v486_v36 = vld [vmem:[%s2886_s1 + $0x218] sm:$0xff]  ;;  %v673_v38 = vld [vmem:[%s2887_s2 + $0x50] sm:$0xff] }
  0x37   : > { %622 = vmatpush.msrb.mxu1 %v514_v56  ;;  %596 = vmatpush.msra.mxu3 %v468_v6  ;;  %v502_v37 = vld [vmem:[%s2886_s1 + $0x298] sm:$0xff]  ;;  %v485_v39 = vld [vmem:[%s2886_s1 + $0x210] sm:$0xff]  ;;  %v672_v41 = vld [vmem:[%s2887_s2 + $0x48] sm:$0xff] }
  0x38   : > { %603 = vmatpush.msrb.mxu0 %v497_v59  ;;  %577 = vmatpush.msra.mxu2 %v451_v5  ;;  %v501_v40 = vld [vmem:[%s2886_s1 + $0x290] sm:$0xff]  ;;  %v484_v42 = vld [vmem:[%s2886_s1 + $0x208] sm:$0xff]  ;;  %v483_v44 = vld [vmem:[%s2886_s1 + $0x200] sm:$0xff] }
  0x39   : > { %623 = vmatpush.msrb.mxu1 %v513_v60  ;;  %578 = vmatmul.f32.vlgmr.msra.gmra.mxu2 %v414_v9  ;;  %v500_v43 = vld [vmem:[%s2886_s1 + $0x288] sm:$0xff]  ;;  %v499_v45 = vld [vmem:[%s2886_s1 + $0x280] sm:$0xff]  ;;  %v670_v49 = vld [vmem:[%s2887_s2 + $0x38] sm:$0xff] }
  0x3a   : > { %604 = vmatpush.msrb.mxu0 %v496_v63  ;;  %597 = vmatpush.msra.mxu3 %v467_v10  ;;  %v416_v46 = vld [vmem:[%s1935_s15 + $0x20] sm:$0xff]  ;;  %v417_v47 = vld [vmem:[%s1935_s15 + $0x28] sm:$0xff]  ;;  %v669_v50 = vld [vmem:[%s2887_s2 + $0x30] sm:$0xff]  ;;  %s1557_s15 = scalar_lea.hbm %s1556_s26, 56 }
  0x3b   : > { %624 = vmatpush.msrb.mxu1 %v512_v0  ;;  %656 = vmatpush.msrb.mxu2 %v516_v13  ;;  %v671_v48 = vld [vmem:[%s2887_s2 + $0x40] sm:$0xff]  ;;  %v668_v51 = vld [vmem:[%s2887_s2 + $0x28] sm:$0xff]  ;;  %v666_v53 = vld [vmem:[%s2887_s2 + $0x18] sm:$0xff]  ;;  %p1558_p11 = scmp.ne.s32.totalorder %s1556_s26, %s1557_s15  ;;  %p1563_p1 = scmp.lt.s32.totalorder %s1561_s28, %s1557_s15 }
  0x3c   : > { %605 = vmatpush.msrb.mxu0 %v495_v3  ;;  %598 = vmatmul.f32.vlgmr.msra.gmra.mxu3 %v415_v17  ;;  %v667_v52 = vld [vmem:[%s2887_s2 + $0x20] sm:$0xff]  ;;  %v665_v54 = vld [vmem:[%s2887_s2 + $0x10] sm:$0xff]  ;;  %v664_v55 = vld [vmem:[%s2887_s2 + $0x8] sm:$0xff] }
  0x3d   : > { %625 = vmatpush.msrb.mxu1 %v511_v4  ;;  %538 = vmatmul.f32.vlgmr.msra.gmra.mxu0 %v412_v14  ;;  %v663_v56 = vld [vmem:[%s2887_s2] sm:$0xff]  ;;  %v716_v57 = vld [vmem:[%s2888_s3 + $0x78] sm:$0xff]  ;;  %v715_v58 = vld [vmem:[%s2888_s3 + $0x70] sm:$0xff]  ;;  %p1559_p12 = pnand %p1558_p11, %p1708_p5  ;;  %p1564_p2 = por %p1563_p1, %p1562_p0 }
  0x3e   : > { %606 = vmatpush.msrb.mxu0 %v494_v7  ;;  %558 = vmatmul.f32.vlgmr.msra.gmra.mxu1 %v413_v18  ;;  %v714_v59 = vld [vmem:[%s2888_s3 + $0x68] sm:$0xff]  ;;  %v713_v60 = vld [vmem:[%s2888_s3 + $0x60] sm:$0xff]  ;;  %v712_v63 = vld [vmem:[%s2888_s3 + $0x58] sm:$0xff] }
  0x3f   : > { %626 = vmatpush.msrb.mxu1 %v510_v8  ;;  %657 = vmatpush.msrb.mxu2 %v515_v21  ;;  %v517_v61 = vld [vmem:[%s2896_s11] ss:$0 sm:$0xff]  ;;  %v711_v1 = vld [vmem:[%s2888_s3 + $0x50] sm:$0xff]  ;;  %v710_v3 = vld [vmem:[%s2888_s3 + $0x48] sm:$0xff]  ;;  %p1560_p13 = pneg %p1559_p12 }
  0x40   : > { %607 = vmatpush.msrb.mxu0 %v493_v11  ;;  %680 = vmatpush.msrb.mxu3 %v678_v22  ;;  %v709_v5 = vld [vmem:[%s2888_s3 + $0x40] sm:$0xff]  ;;  %v708_v7 = vld [vmem:[%s2888_s3 + $0x38] sm:$0xff]  ;;  %v707_v9 = vld [vmem:[%s2888_s3 + $0x30] sm:$0xff] }
  0x41   : > { %627 = vmatpush.msrb.mxu1 %v509_v12  ;;  %1458 = vmatmul.msk.f32.vlgmr.msrb.gmra.mxu2 %vm518_vm0, %v418_v25  ;;  %v706_v11 = vld [vmem:[%s2888_s3 + $0x28] sm:$0xff]  ;;  %v705_v13 = vld [vmem:[%s2888_s3 + $0x20] sm:$0xff]  ;;  %v704_v14 = vld [vmem:[%s2888_s3 + $0x18] sm:$0xff]  ;;  %p1565_p3 = pnand %p1564_p2, %p1560_p13 }
  0x42   : > { %608 = vmatpush.msrb.mxu0 %v492_v15  ;;  %681 = vmatpush.msrb.mxu3 %v677_v26  ;;  %v703_v22 = vld [vmem:[%s2888_s3 + $0x10] sm:$0xff]  ;;  %v754_v25 = vld [vmem:[%s2889_s4 + $0x78] sm:$0xff] }
  0x43   : > { %628 = vmatpush.msrb.mxu1 %v508_v16  ;;  %718 = vmatpush.msra.mxu2 %v716_v57  ;;  %v753_v26 = vld [vmem:[%s2889_s4 + $0x70] sm:$0xff]  ;;  %v780_v57 = vld [vmem:[%s2890_s5 + $0x18] sm:$0xff] }
  0x44   : > { %609 = vmatpush.msrb.mxu0 %v491_v19  ;;  %682 = vmatpush.msrb.mxu3 %v676_v29  ;;  %v750_v29 = vld [vmem:[%s2889_s4 + $0x58] sm:$0xff] }
  0x45   : > { %629 = vmatpush.msrb.mxu1 %v507_v20  ;;  %719 = vmatpush.msra.mxu2 %v715_v58  ;;  %v717_v58 = vld [vmem:[%s2896_s11 + $0x2] ss:$0 sm:$0xff] }
  0x46   : > { %610 = vmatpush.msrb.mxu0 %v490_v23  ;;  %683 = vmatpush.msrb.mxu3 %v675_v32  ;;  %v702_v23 = vld [vmem:[%s2888_s3 + $0x8] sm:$0xff]  ;;  %v747_v32 = vld [vmem:[%s2889_s4 + $0x40] sm:$0xff] }
  0x47   : > { %630 = vmatpush.msrb.mxu1 %v506_v24  ;;  %720 = vmatpush.msra.mxu2 %v714_v59  ;;  %v701_v24 = vld [vmem:[%s2888_s3] sm:$0xff] }
  0x48   : > { %611 = vmatpush.msrb.mxu0 %v489_v27  ;;  %684 = vmatpush.msrb.mxu3 %v674_v35  ;;  %v752_v27 = vld [vmem:[%s2889_s4 + $0x68] sm:$0xff] }
  0x49   : > { %631 = vmatpush.msrb.mxu1 %v505_v28  ;;  %721 = vmatpush.msra.mxu2 %v713_v60  ;;  %v751_v28 = vld [vmem:[%s2889_s4 + $0x60] sm:$0xff]  ;;  %v744_v35 = vld [vmem:[%s2889_s4 + $0x28] sm:$0xff] }
  0x4a   : > { %612 = vmatpush.msrb.mxu0 %v488_v30  ;;  %685 = vmatpush.msrb.mxu3 %v673_v38  ;;  %v749_v30 = vld [vmem:[%s2889_s4 + $0x50] sm:$0xff]  ;;  %v679_v38 = vld [vmem:[%s2896_s11 + $0x1] ss:$0 sm:$0xff] }
  0x4b   : > { %632 = vmatpush.msrb.mxu1 %v504_v31  ;;  %722 = vmatpush.msra.mxu2 %v712_v63  ;;  %v748_v31 = vld [vmem:[%s2889_s4 + $0x48] sm:$0xff] }
  0x4c   : > { %613 = vmatpush.msrb.mxu0 %v487_v33  ;;  %686 = vmatpush.msrb.mxu3 %v672_v41  ;;  %v746_v33 = vld [vmem:[%s2889_s4 + $0x38] sm:$0xff]  ;;  %v778_v63 = vld [vmem:[%s2890_s5 + $0x8] sm:$0xff] }
  0x4d   : > { %633 = vmatpush.msrb.mxu1 %v503_v34  ;;  %723 = vmatpush.msra.mxu2 %v711_v1  ;;  %v745_v34 = vld [vmem:[%s2889_s4 + $0x30] sm:$0xff]  ;;  %v829_v1 = vld [vmem:[%s2891_s6 + $0x78] sm:$0xff] }
  0x4e   : > { %614 = vmatpush.msrb.mxu0 %v486_v36  ;;  %687 = vmatpush.msrb.mxu3 %v671_v48  ;;  %v743_v36 = vld [vmem:[%s2889_s4 + $0x20] sm:$0xff] }
  0x4f   : > { %634 = vmatpush.msrb.mxu1 %v502_v37  ;;  %724 = vmatpush.msra.mxu2 %v710_v3  ;;  %v742_v37 = vld [vmem:[%s2889_s4 + $0x18] sm:$0xff]  ;;  %v789_v48 = vld [vmem:[%s2890_s5 + $0x60] sm:$0xff]  ;;  %v827_v3 = vld [vmem:[%s2891_s6 + $0x68] sm:$0xff] }
  0x50   : > { %615 = vmatpush.msrb.mxu0 %v485_v39  ;;  %688 = vmatpush.msrb.mxu3 %v670_v49  ;;  %v788_v49 = vld [vmem:[%s2890_s5 + $0x58] sm:$0xff] }
  0x51   : > { %635 = vmatpush.msrb.mxu1 %v501_v40  ;;  %725 = vmatpush.msra.mxu2 %v709_v5  ;;  %v825_v5 = vld [vmem:[%s2891_s6 + $0x58] sm:$0xff] }
  0x52   : > { %616 = vmatpush.msrb.mxu0 %v484_v42  ;;  %689 = vmatpush.msrb.mxu3 %v669_v50  ;;  %v741_v42 = vld [vmem:[%s2889_s4 + $0x10] sm:$0xff] }
  0x53   : > { %636 = vmatpush.msrb.mxu1 %v500_v43  ;;  %726 = vmatpush.msra.mxu2 %v708_v7  ;;  %v740_v43 = vld [vmem:[%s2889_s4 + $0x8] sm:$0xff]  ;;  %v787_v50 = vld [vmem:[%s2890_s5 + $0x50] sm:$0xff] }
  0x54   : > { %617 = vmatpush.msrb.mxu0 %v483_v44  ;;  %690 = vmatpush.msrb.mxu3 %v668_v51  ;;  %v739_v44 = vld [vmem:[%s2889_s4] sm:$0xff]  ;;  %v786_v51 = vld [vmem:[%s2890_s5 + $0x48] sm:$0xff] }
  0x55   : > { %637 = vmatpush.msrb.mxu1 %v499_v45  ;;  %618 = vmatmul.f32.vlgmr.msrb.gmra.mxu0 %v416_v46  ;;  %v792_v45 = vld [vmem:[%s2890_s5 + $0x78] sm:$0xff]  ;;  %v791_v46 = vld [vmem:[%s2890_s5 + $0x70] sm:$0xff]  ;;  %v823_v7 = vld [vmem:[%s2891_s6 + $0x48] sm:$0xff] }
  0x56   : > { %638 = vmatmul.f32.vlgmr.msrb.gmra.mxu1 %v417_v47  ;;  %691 = vmatpush.msrb.mxu3 %v667_v52  ;;  %v790_v47 = vld [vmem:[%s2890_s5 + $0x68] sm:$0xff]  ;;  %v785_v52 = vld [vmem:[%s2890_s5 + $0x40] sm:$0xff] }
  0x57   : > { %727 = vmatpush.msra.mxu2 %v707_v9  ;;  %756 = vmatpush.msra.mxu0 %v754_v25  ;;  %v821_v9 = vld [vmem:[%s2891_s6 + $0x38] sm:$0xff] }
  0x58   : > { %692 = vmatpush.msrb.mxu3 %v666_v53  ;;  %794 = vmatpush.msra.mxu1 %v792_v45  ;;  %v784_v53 = vld [vmem:[%s2890_s5 + $0x38] sm:$0xff]  ;;  %v900_v45 = vld [vmem:[%s2893_s8 + $0x50] sm:$0xff] }
  0x59   : > { %728 = vmatpush.msra.mxu2 %v706_v11  ;;  %757 = vmatpush.msra.mxu0 %v753_v26  ;;  %v819_v11 = vld [vmem:[%s2891_s6 + $0x28] sm:$0xff]  ;;  %v863_v25 = vld [vmem:[%s2892_s7 + $0x58] sm:$0xff]  ;;  %v862_v26 = vld [vmem:[%s2892_s7 + $0x50] sm:$0xff] }
  0x5a   : > { %693 = vmatpush.msrb.mxu3 %v665_v54  ;;  %795 = vmatpush.msra.mxu1 %v791_v46  ;;  %v783_v54 = vld [vmem:[%s2890_s5 + $0x30] sm:$0xff]  ;;  %v899_v46 = vld [vmem:[%s2893_s8 + $0x48] sm:$0xff] }
  0x5b   : > { %729 = vmatpush.msra.mxu2 %v705_v13  ;;  %758 = vmatpush.msra.mxu0 %v752_v27  ;;  %v817_v13 = vld [vmem:[%s2891_s6 + $0x18] sm:$0xff]  ;;  %v861_v27 = vld [vmem:[%s2892_s7 + $0x48] sm:$0xff] }
  0x5c   : > { %694 = vmatpush.msrb.mxu3 %v664_v55  ;;  %796 = vmatpush.msra.mxu1 %v790_v47  ;;  %v782_v55 = vld [vmem:[%s2890_s5 + $0x28] sm:$0xff]  ;;  %v898_v47 = vld [vmem:[%s2893_s8 + $0x40] sm:$0xff] }
  0x5d   : > { %730 = vmatpush.msra.mxu2 %v704_v14  ;;  %759 = vmatpush.msra.mxu0 %v751_v28  ;;  %v816_v14 = vld [vmem:[%s2891_s6 + $0x10] sm:$0xff]  ;;  %v860_v28 = vld [vmem:[%s2892_s7 + $0x40] sm:$0xff] }
  0x5e   : > { %695 = vmatpush.msrb.mxu3 %v663_v56  ;;  %797 = vmatpush.msra.mxu1 %v789_v48  ;;  %v781_v56 = vld [vmem:[%s2890_s5 + $0x20] sm:$0xff]  ;;  %v897_v48 = vld [vmem:[%s2893_s8 + $0x38] sm:$0xff] }
  0x5f   : > { %731 = vmatpush.msra.mxu2 %v703_v22  ;;  %760 = vmatpush.msra.mxu0 %v750_v29  ;;  %v866_v22 = vld [vmem:[%s2892_s7 + $0x70] sm:$0xff]  ;;  %v859_v29 = vld [vmem:[%s2892_s7 + $0x38] sm:$0xff] }
  0x60   : > { %798 = vmatpush.msra.mxu1 %v788_v49  ;;  %831 = vmatpush.msra.mxu3 %v829_v1  ;;  %v896_v49 = vld [vmem:[%s2893_s8 + $0x30] sm:$0xff] }
  0x61   : > { %732 = vmatpush.msra.mxu2 %v702_v23  ;;  %761 = vmatpush.msra.mxu0 %v749_v30  ;;  %v865_v23 = vld [vmem:[%s2892_s7 + $0x68] sm:$0xff]  ;;  %v858_v30 = vld [vmem:[%s2892_s7 + $0x30] sm:$0xff] }
  0x62   : > { %799 = vmatpush.msra.mxu1 %v787_v50  ;;  %v895_v50 = vld [vmem:[%s2893_s8 + $0x28] sm:$0xff]  ;;  %v938_v1 = vld [vmem:[%s2894_s9 + $0x50] sm:$0xff] }
  0x63   : > { %733 = vmatpush.msra.mxu2 %v701_v24  ;;  %762 = vmatpush.msra.mxu0 %v748_v31  ;;  %v864_v24 = vld [vmem:[%s2892_s7 + $0x60] sm:$0xff]  ;;  %v857_v31 = vld [vmem:[%s2892_s7 + $0x28] sm:$0xff] }
  0x64   : > { %800 = vmatpush.msra.mxu1 %v786_v51  ;;  %v894_v51 = vld [vmem:[%s2893_s8 + $0x20] sm:$0xff] }
  0x65   : > { %763 = vmatpush.msra.mxu0 %v747_v32  ;;  %v856_v32 = vld [vmem:[%s2892_s7 + $0x20] sm:$0xff] }
  0x66   : > { %801 = vmatpush.msra.mxu1 %v785_v52  ;;  %v893_v52 = vld [vmem:[%s2893_s8 + $0x18] sm:$0xff] }
  0x67   : > { %764 = vmatpush.msra.mxu0 %v746_v33  ;;  %v855_v33 = vld [vmem:[%s2892_s7 + $0x18] sm:$0xff] }
  0x68   : > { %802 = vmatpush.msra.mxu1 %v784_v53  ;;  %v830_v53 = vld [vmem:[%s2896_s11 + $0x5] ss:$0 sm:$0xff] }
  0x69   : > { %765 = vmatpush.msra.mxu0 %v745_v34  ;;  %v793_v34 = vld [vmem:[%s2896_s11 + $0x4] ss:$0 sm:$0xff] }
  0x6a   : > { %803 = vmatpush.msra.mxu1 %v783_v54 }
  0x6b   : > { %766 = vmatpush.msra.mxu0 %v744_v35 }
  0x6c   : > { %804 = vmatpush.msra.mxu1 %v782_v55 }
  0x6d   : > { %767 = vmatpush.msra.mxu0 %v743_v36 }
  0x6e   : > { %805 = vmatpush.msra.mxu1 %v781_v56 }
  0x6f   : > { %768 = vmatpush.msra.mxu0 %v742_v37  ;;  %v854_v37 = vld [vmem:[%s2892_s7 + $0x10] sm:$0xff] }
  0x70   : > { %806 = vmatpush.msra.mxu1 %v780_v57  ;;  %v892_v57 = vld [vmem:[%s2893_s8 + $0x10] sm:$0xff] }
  0x71   : > { %769 = vmatpush.msra.mxu0 %v741_v42  ;;  %v903_v42 = vld [vmem:[%s2893_s8 + $0x68] sm:$0xff] }
  0x73   : > { %770 = vmatpush.msra.mxu0 %v740_v43  ;;  %v902_v43 = vld [vmem:[%s2893_s8 + $0x60] sm:$0xff] }
  0x75   : > { %771 = vmatpush.msra.mxu0 %v739_v44  ;;  %v901_v44 = vld [vmem:[%s2893_s8 + $0x58] sm:$0xff] }
  0xba   : > { %v539_v62 = vpop.f32.mrf.mxu0 }
  0xbb   : > { %v540_v0 = vadd.f32 %v539_v62, %v517_v61  ;;  %v559_v2 = vpop.f32.mrf.mxu1  ;;  %v779_v62 = vld [vmem:[%s2890_s5 + $0x10] sm:$0xff] }
  0xbc   : > { %v579_v6 = vpop.f32.mrf.mxu2  ;;  %807 = vmatpush.msra.mxu1 %v779_v62  ;;  %v941_v62 = vld [vmem:[%s2894_s9 + $0x68] sm:$0xff] }
  0xbd   : > { %v560_v4 = vadd.f32 %v559_v2, %v540_v0  ;;  %v777_v0 = vld [vmem:[%s2890_s5] sm:$0xff]  ;;  %v828_v2 = vld [vmem:[%s2891_s6 + $0x70] sm:$0xff] }
  0xbe   : > { %808 = vmatpush.msra.mxu1 %v778_v63  ;;  %832 = vmatpush.msra.mxu3 %v828_v2  ;;  %v940_v63 = vld [vmem:[%s2894_s9 + $0x60] sm:$0xff]  ;;  %v937_v2 = vld [vmem:[%s2894_s9 + $0x48] sm:$0xff] }
  0xbf   : > { %v580_v8 = vadd.f32 %v579_v6, %v560_v4  ;;  %v599_v10 = vpop.f32.mrf.mxu3  ;;  %v826_v4 = vld [vmem:[%s2891_s6 + $0x60] sm:$0xff]  ;;  %v824_v6 = vld [vmem:[%s2891_s6 + $0x50] sm:$0xff] }
  0xc0   : > { %809 = vmatpush.msra.mxu1 %v777_v0  ;;  %833 = vmatpush.msra.mxu3 %v827_v3  ;;  %v939_v0 = vld [vmem:[%s2894_s9 + $0x58] sm:$0xff]  ;;  %v936_v3 = vld [vmem:[%s2894_s9 + $0x40] sm:$0xff] }
  0xc1   : > { %v600_v12 = vadd.f32 %v599_v10, %v580_v8  ;;  %v822_v8 = vld [vmem:[%s2891_s6 + $0x40] sm:$0xff]  ;;  %v820_v10 = vld [vmem:[%s2891_s6 + $0x30] sm:$0xff] }
  0xc2   : > { %834 = vmatpush.msra.mxu3 %v826_v4  ;;  %v935_v4 = vld [vmem:[%s2894_s9 + $0x38] sm:$0xff] }
  0xc4   : > { %v659_v18 = vpop.f32.mrf.mxu2  ;;  %835 = vmatpush.msra.mxu3 %v825_v5  ;;  %v934_v5 = vld [vmem:[%s2894_s9 + $0x30] sm:$0xff] }
  0xc6   : > { %836 = vmatpush.msra.mxu3 %v824_v6  ;;  %v933_v6 = vld [vmem:[%s2894_s9 + $0x28] sm:$0xff] }
  0xc8   : > { %837 = vmatpush.msra.mxu3 %v823_v7  ;;  %v932_v7 = vld [vmem:[%s2894_s9 + $0x20] sm:$0xff] }
  0xca   : > { %838 = vmatpush.msra.mxu3 %v822_v8  ;;  %v931_v8 = vld [vmem:[%s2894_s9 + $0x18] sm:$0xff] }
  0xcc   : > { %839 = vmatpush.msra.mxu3 %v821_v9  ;;  %v868_v9 = vld [vmem:[%s2896_s11 + $0x6] ss:$0 sm:$0xff] }
  0xce   : > { %840 = vmatpush.msra.mxu3 %v820_v10 }
  0xd0   : > { %841 = vmatpush.msra.mxu3 %v819_v11 }
  0xd2   : > { %v619_v15 = vpop.f32.mrf.mxu0 }
  0xd3   : > { %v639_v16 = vpop.f32.mrf.mxu1  ;;  %v620_v17 = vadd.f32 %v619_v15, %v600_v12  ;;  %v818_v12 = vld [vmem:[%s2891_s6 + $0x20] sm:$0xff] }
  0xd4   : > { %842 = vmatpush.msra.mxu3 %v818_v12  ;;  %v755_v15 = vld [vmem:[%s2896_s11 + $0x3] ss:$0 sm:$0xff] }
  0xd5   : > { %v640_v19 = vadd.f32 %v639_v16, %v620_v17 }
  0xd6   : > { %843 = vmatpush.msra.mxu3 %v817_v13  ;;  %v930_v13 = vld [vmem:[%s2894_s9 + $0x10] sm:$0xff] }
  0xd7   : > { %v660_v20 = vadd.f32 %v659_v18, %v640_v19  ;;  %v815_v19 = vld [vmem:[%s2891_s6 + $0x8] sm:$0xff] }
  0xd8   : > { %844 = vmatpush.msra.mxu3 %v816_v14  ;;  %v929_v14 = vld [vmem:[%s2894_s9 + $0x8] sm:$0xff] }
  0xd9   : > { %v662_v21 = vmax.f32 %v660_v20, 0.0  ;;  %v814_v20 = vld [vmem:[%s2891_s6] sm:$0xff] }
  0xda   : > { %845 = vmatpush.msra.mxu3 %v815_v19  ;;  %v1064_v19 = vld [vmem:[%s2895_s10 + $0x310] sm:$0xff] }
  0xdb   : > { %696 = vmatmul.f32.vlgmr.msrb.gmra.mxu3 %v662_v21  ;;  %v867_v21 = vld [vmem:[%s2892_s7 + $0x78] sm:$0xff] }
  0xdc   : > { %846 = vmatpush.msra.mxu3 %v814_v20  ;;  %869 = vmatpush.msrb.mxu2 %v867_v21  ;;  %v1065_v20 = vld [vmem:[%s2895_s10 + $0x318] sm:$0xff]  ;;  %v1066_v21 = vld [vmem:[%s2895_s10 + $0x320] sm:$0xff] }
  0xde   : > { %870 = vmatpush.msrb.mxu2 %v866_v22  ;;  %v1057_v22 = vld [vmem:[%s2895_s10 + $0x2d8] sm:$0xff] }
  0xe0   : > { %871 = vmatpush.msrb.mxu2 %v865_v23  ;;  %v1058_v23 = vld [vmem:[%s2895_s10 + $0x2e0] sm:$0xff] }
  0xe2   : > { %872 = vmatpush.msrb.mxu2 %v864_v24  ;;  %v1059_v24 = vld [vmem:[%s2895_s10 + $0x2e8] sm:$0xff] }
  0xe4   : > { %873 = vmatpush.msrb.mxu2 %v863_v25  ;;  %v1050_v25 = vld [vmem:[%s2895_s10 + $0x2a0] sm:$0xff] }
  0xe6   : > { %874 = vmatpush.msrb.mxu2 %v862_v26  ;;  %v1051_v26 = vld [vmem:[%s2895_s10 + $0x2a8] sm:$0xff] }
  0xe8   : > { %875 = vmatpush.msrb.mxu2 %v861_v27  ;;  %v1052_v27 = vld [vmem:[%s2895_s10 + $0x2b0] sm:$0xff] }
  0xea   : > { %876 = vmatpush.msrb.mxu2 %v860_v28  ;;  %v1043_v28 = vld [vmem:[%s2895_s10 + $0x268] sm:$0xff] }
  0xec   : > { %877 = vmatpush.msrb.mxu2 %v859_v29  ;;  %v1044_v29 = vld [vmem:[%s2895_s10 + $0x270] sm:$0xff] }
  0xee   : > { %878 = vmatpush.msrb.mxu2 %v858_v30  ;;  %v1045_v30 = vld [vmem:[%s2895_s10 + $0x278] sm:$0xff] }
  0xf0   : > { %879 = vmatpush.msrb.mxu2 %v857_v31  ;;  %v1036_v31 = vld [vmem:[%s2895_s10 + $0x230] sm:$0xff] }
  0xf2   : > { %880 = vmatpush.msrb.mxu2 %v856_v32  ;;  %v1037_v32 = vld [vmem:[%s2895_s10 + $0x238] sm:$0xff] }
  0xf4   : > { %881 = vmatpush.msrb.mxu2 %v855_v33  ;;  %v1038_v33 = vld [vmem:[%s2895_s10 + $0x240] sm:$0xff] }
  0xf6   : > { %882 = vmatpush.msrb.mxu2 %v854_v37  ;;  %v1022_v37 = vld [vmem:[%s2895_s10 + $0x1c0] sm:$0xff] }
 0x15e   : > { %v697_v39 = vpop.f32.mrf.mxu3 }
 0x15f   : > { %v698_v40 = vadd.f32 %v697_v39, %v679_v38  ;;  %v853_v38 = vld [vmem:[%s2892_s7 + $0x8] sm:$0xff]  ;;  %v852_v39 = vld [vmem:[%s2892_s7] sm:$0xff] }
 0x160   : > { %883 = vmatpush.msrb.mxu2 %v853_v38  ;;  %v1023_v38 = vld [vmem:[%s2895_s10 + $0x1c8] sm:$0xff] }
 0x161   : > { %v700_v41 = vmax.f32 %v698_v40, 0.0  ;;  %v905_v40 = vld [vmem:[%s2893_s8 + $0x78] sm:$0xff] }
 0x162   : > { %884 = vmatpush.msrb.mxu2 %v852_v39  ;;  %907 = vmatpush.msrb.mxu0 %v905_v40  ;;  %v1074_v39 = vld [vmem:[%s2895_s10 + $0x360] sm:$0xff]  ;;  %v1024_v40 = vld [vmem:[%s2895_s10 + $0x1d0] sm:$0xff] }
 0x163   : > { %734 = vmatmul.f32.vlgmr.msra.gmra.mxu2 %v700_v41  ;;  %v904_v41 = vld [vmem:[%s2893_s8 + $0x70] sm:$0xff] }
 0x164   : > { %908 = vmatpush.msrb.mxu0 %v904_v41  ;;  %v1067_v41 = vld [vmem:[%s2895_s10 + $0x328] sm:$0xff] }
 0x166   : > { %909 = vmatpush.msrb.mxu0 %v903_v42  ;;  %v1015_v42 = vld [vmem:[%s2895_s10 + $0x188] sm:$0xff] }
 0x168   : > { %910 = vmatpush.msrb.mxu0 %v902_v43  ;;  %v1016_v43 = vld [vmem:[%s2895_s10 + $0x190] sm:$0xff] }
 0x16a   : > { %911 = vmatpush.msrb.mxu0 %v901_v44  ;;  %v1017_v44 = vld [vmem:[%s2895_s10 + $0x198] sm:$0xff] }
 0x16c   : > { %912 = vmatpush.msrb.mxu0 %v900_v45  ;;  %v1060_v45 = vld [vmem:[%s2895_s10 + $0x2f0] sm:$0xff] }
 0x16e   : > { %913 = vmatpush.msrb.mxu0 %v899_v46  ;;  %v1008_v46 = vld [vmem:[%s2895_s10 + $0x150] sm:$0xff] }
 0x170   : > { %914 = vmatpush.msrb.mxu0 %v898_v47  ;;  %v1009_v47 = vld [vmem:[%s2895_s10 + $0x158] sm:$0xff] }
 0x172   : > { %915 = vmatpush.msrb.mxu0 %v897_v48  ;;  %v1010_v48 = vld [vmem:[%s2895_s10 + $0x160] sm:$0xff] }
 0x174   : > { %916 = vmatpush.msrb.mxu0 %v896_v49  ;;  %v1053_v49 = vld [vmem:[%s2895_s10 + $0x2b8] sm:$0xff] }
 0x176   : > { %917 = vmatpush.msrb.mxu0 %v895_v50  ;;  %v1001_v50 = vld [vmem:[%s2895_s10 + $0x118] sm:$0xff] }
 0x178   : > { %918 = vmatpush.msrb.mxu0 %v894_v51  ;;  %v1002_v51 = vld [vmem:[%s2895_s10 + $0x120] sm:$0xff] }
 0x17a   : > { %919 = vmatpush.msrb.mxu0 %v893_v52  ;;  %v1003_v52 = vld [vmem:[%s2895_s10 + $0x128] sm:$0xff] }
 0x17c   : > { %920 = vmatpush.msrb.mxu0 %v892_v57  ;;  %v1039_v57 = vld [vmem:[%s2895_s10 + $0x248] sm:$0xff] }
 0x1e6   : > { %v735_v59 = vpop.f32.mrf.mxu2 }
 0x1e7   : > { %v736_v60 = vadd.f32 %v735_v59, %v717_v58  ;;  %v891_v58 = vld [vmem:[%s2893_s8 + $0x8] sm:$0xff]  ;;  %v890_v59 = vld [vmem:[%s2893_s8] sm:$0xff] }
 0x1e8   : > { %921 = vmatpush.msrb.mxu0 %v891_v58  ;;  %v987_v58 = vld [vmem:[%s2895_s10 + $0xa8] sm:$0xff] }
 0x1e9   : > { %v738_v61 = vmax.f32 %v736_v60, 0.0  ;;  %v943_v60 = vld [vmem:[%s2894_s9 + $0x78] sm:$0xff] }
 0x1ea   : > { %922 = vmatpush.msrb.mxu0 %v890_v59  ;;  %945 = vmatpush.msrb.mxu1 %v943_v60  ;;  %v988_v59 = vld [vmem:[%s2895_s10 + $0xb0] sm:$0xff]  ;;  %v989_v60 = vld [vmem:[%s2895_s10 + $0xb8] sm:$0xff] }
 0x1eb   : > { %772 = vmatmul.f32.vlgmr.msra.gmra.mxu0 %v738_v61  ;;  %v942_v61 = vld [vmem:[%s2894_s9 + $0x70] sm:$0xff] }
 0x1ec   : > { %946 = vmatpush.msrb.mxu1 %v942_v61  ;;  %v1032_v61 = vld [vmem:[%s2895_s10 + $0x210] sm:$0xff] }
 0x1ee   : > { %947 = vmatpush.msrb.mxu1 %v941_v62  ;;  %v980_v62 = vld [vmem:[%s2895_s10 + $0x70] sm:$0xff] }
 0x1f0   : > { %948 = vmatpush.msrb.mxu1 %v940_v63  ;;  %v981_v63 = vld [vmem:[%s2895_s10 + $0x78] sm:$0xff] }
 0x1f2   : > { %949 = vmatpush.msrb.mxu1 %v939_v0  ;;  %v906_v0 = vld [vmem:[%s2896_s11 + $0x7] ss:$0 sm:$0xff] }
 0x1f4   : > { %950 = vmatpush.msrb.mxu1 %v938_v1  ;;  %v982_v1 = vld [vmem:[%s2895_s10 + $0x80] sm:$0xff] }
 0x1f6   : > { %951 = vmatpush.msrb.mxu1 %v937_v2  ;;  %v1025_v2 = vld [vmem:[%s2895_s10 + $0x1d8] sm:$0xff] }
 0x1f8   : > { %952 = vmatpush.msrb.mxu1 %v936_v3  ;;  %v973_v3 = vld [vmem:[%s2895_s10 + $0x38] sm:$0xff] }
 0x1fa   : > { %953 = vmatpush.msrb.mxu1 %v935_v4  ;;  %v974_v4 = vld [vmem:[%s2895_s10 + $0x40] sm:$0xff] }
 0x1fc   : > { %954 = vmatpush.msrb.mxu1 %v934_v5 }
 0x1fe   : > { %955 = vmatpush.msrb.mxu1 %v933_v6  ;;  %v975_v6 = vld [vmem:[%s2895_s10 + $0x48] sm:$0xff] }
 0x200   : > { %956 = vmatpush.msrb.mxu1 %v932_v7  ;;  %v1018_v7 = vld [vmem:[%s2895_s10 + $0x1a0] sm:$0xff] }
 0x202   : > { %957 = vmatpush.msrb.mxu1 %v931_v8 }
 0x204   : > { %958 = vmatpush.msrb.mxu1 %v930_v13  ;;  %v1075_v13 = vld [vmem:[%s2895_s10 + $0x368] sm:$0xff] }
 0x206   : > { %959 = vmatpush.msrb.mxu1 %v929_v14  ;;  %v1076_v14 = vld [vmem:[%s2895_s10 + $0x370] sm:$0xff] }
 0x268   : > { %v773_v16 = vpop.f32.mrf.mxu0 }
 0x269   : > { %v774_v17 = vadd.f32 %v773_v16, %v755_v15  ;;  %v928_v15 = vld [vmem:[%s2894_s9] sm:$0xff]  ;;  %v1071_v16 = vld [vmem:[%s2895_s10 + $0x348] sm:$0xff] }
 0x26a   : > { %960 = vmatpush.msrb.mxu1 %v928_v15  ;;  %1097 = vmatpush.msrb.mxu3 %v1071_v16  ;;  %v1077_v15 = vld [vmem:[%s2895_s10 + $0x378] sm:$0xff]  ;;  %v1011_v16 = vld [vmem:[%s2895_s10 + $0x168] sm:$0xff] }
 0x26b   : > { %v776_v18 = vmax.f32 %v774_v17, 0.0  ;;  %v1072_v17 = vld [vmem:[%s2895_s10 + $0x350] sm:$0xff] }
 0x26c   : > { %1117 = vmatpush.msra.mxu2 %v1072_v17  ;;  %1098 = vmatpush.msrb.mxu3 %v1064_v19  ;;  %v1068_v17 = vld [vmem:[%s2895_s10 + $0x330] sm:$0xff]  ;;  %v1070_v19 = vld [vmem:[%s2895_s10 + $0x340] sm:$0xff] }
 0x26d   : > { %810 = vmatmul.f32.vlgmr.msra.gmra.mxu1 %v776_v18  ;;  %v1073_v18 = vld [vmem:[%s2895_s10 + $0x358] sm:$0xff] }
 0x26e   : > { %1137 = vmatpush.msra.mxu0 %v1073_v18  ;;  %1118 = vmatpush.msra.mxu2 %v1065_v20  ;;  %v1069_v18 = vld [vmem:[%s2895_s10 + $0x338] sm:$0xff]  ;;  %v1004_v20 = vld [vmem:[%s2895_s10 + $0x130] sm:$0xff] }
 0x26f   : > { %1099 = vmatpush.msrb.mxu3 %v1057_v22  ;;  %1157 = vmatpush.msra.mxu1 %v1074_v39  ;;  %v1062_v22 = vld [vmem:[%s2895_s10 + $0x300] sm:$0xff]  ;;  %v1027_v39 = vld [vmem:[%s2895_s10 + $0x1e8] sm:$0xff] }
 0x270   : > { %1138 = vmatpush.msra.mxu0 %v1066_v21  ;;  %1119 = vmatpush.msra.mxu2 %v1058_v23  ;;  %v1061_v21 = vld [vmem:[%s2895_s10 + $0x2f8] sm:$0xff]  ;;  %v1063_v23 = vld [vmem:[%s2895_s10 + $0x308] sm:$0xff] }
 0x271   : > { %1100 = vmatpush.msrb.mxu3 %v1050_v25  ;;  %1158 = vmatpush.msra.mxu1 %v1067_v41  ;;  %v1054_v25 = vld [vmem:[%s2895_s10 + $0x2c0] sm:$0xff]  ;;  %v1019_v41 = vld [vmem:[%s2895_s10 + $0x1a8] sm:$0xff] }
 0x272   : > { %1139 = vmatpush.msra.mxu0 %v1059_v24  ;;  %1120 = vmatpush.msra.mxu2 %v1051_v26  ;;  %v997_v24 = vld [vmem:[%s2895_s10 + $0xf8] sm:$0xff]  ;;  %v1055_v26 = vld [vmem:[%s2895_s10 + $0x2c8] sm:$0xff] }
 0x273   : > { %1101 = vmatpush.msrb.mxu3 %v1043_v28  ;;  %1159 = vmatpush.msra.mxu1 %v1060_v45  ;;  %v990_v28 = vld [vmem:[%s2895_s10 + $0xc0] sm:$0xff]  ;;  %v1012_v45 = vld [vmem:[%s2895_s10 + $0x170] sm:$0xff] }
 0x274   : > { %1140 = vmatpush.msra.mxu0 %v1052_v27  ;;  %1121 = vmatpush.msra.mxu2 %v1044_v29  ;;  %v1056_v27 = vld [vmem:[%s2895_s10 + $0x2d0] sm:$0xff]  ;;  %v1047_v29 = vld [vmem:[%s2895_s10 + $0x288] sm:$0xff] }
 0x275   : > { %1102 = vmatpush.msrb.mxu3 %v1036_v31  ;;  %1160 = vmatpush.msra.mxu1 %v1053_v49  ;;  %v1049_v31 = vld [vmem:[%s2895_s10 + $0x298] sm:$0xff] }
 0x276   : > { %1141 = vmatpush.msra.mxu0 %v1045_v30  ;;  %1122 = vmatpush.msra.mxu2 %v1037_v32  ;;  %v1048_v30 = vld [vmem:[%s2895_s10 + $0x290] sm:$0xff]  ;;  %v1005_v49 = vld [vmem:[%s2895_s10 + $0x138] sm:$0xff] }
 0x277   : > { %v1040_v32 = vld [vmem:[%s2895_s10 + $0x250] sm:$0xff] }
 0x278   : > { %1142 = vmatpush.msra.mxu0 %v1038_v33  ;;  %v1041_v33 = vld [vmem:[%s2895_s10 + $0x258] sm:$0xff] }
 0x2ea   : > { %v811_v35 = vpop.f32.mrf.mxu1 }
 0x2eb   : > { %v812_v36 = vadd.f32 %v811_v35, %v793_v34  ;;  %v1029_v34 = vld [vmem:[%s2895_s10 + $0x1f8] sm:$0xff]  ;;  %v1030_v35 = vld [vmem:[%s2895_s10 + $0x200] sm:$0xff] }
 0x2ec   : > { %1103 = vmatpush.msrb.mxu3 %v1029_v34  ;;  %1123 = vmatpush.msra.mxu2 %v1030_v35  ;;  %v1042_v34 = vld [vmem:[%s2895_s10 + $0x260] sm:$0xff]  ;;  %v1033_v35 = vld [vmem:[%s2895_s10 + $0x218] sm:$0xff] }
 0x2ed   : > { %847 = vmatmul.f32.vlgmr.msra.gmra.mxu3 %v812_v36  ;;  %v1031_v36 = vld [vmem:[%s2895_s10 + $0x208] sm:$0xff] }
 0x2ee   : > { %1143 = vmatpush.msra.mxu0 %v1031_v36  ;;  %1104 = vmatpush.msrb.mxu3 %v1022_v37  ;;  %v1034_v36 = vld [vmem:[%s2895_s10 + $0x220] sm:$0xff]  ;;  %v1035_v37 = vld [vmem:[%s2895_s10 + $0x228] sm:$0xff] }
 0x2ef   : > { %1124 = vmatpush.msra.mxu2 %v1023_v38  ;;  %v1026_v38 = vld [vmem:[%s2895_s10 + $0x1e0] sm:$0xff] }
 0x2f0   : > { %1144 = vmatpush.msra.mxu0 %v1024_v40  ;;  %1105 = vmatpush.msrb.mxu3 %v1015_v42  ;;  %v1028_v40 = vld [vmem:[%s2895_s10 + $0x1f0] sm:$0xff] }
 0x2f1   : > { %1125 = vmatpush.msra.mxu2 %v1016_v43  ;;  %v1020_v42 = vld [vmem:[%s2895_s10 + $0x1b0] sm:$0xff]  ;;  %v1021_v43 = vld [vmem:[%s2895_s10 + $0x1b8] sm:$0xff] }
 0x2f2   : > { %1145 = vmatpush.msra.mxu0 %v1017_v44  ;;  %1106 = vmatpush.msrb.mxu3 %v1008_v46  ;;  %v983_v44 = vld [vmem:[%s2895_s10 + $0x88] sm:$0xff]  ;;  %v1013_v46 = vld [vmem:[%s2895_s10 + $0x178] sm:$0xff] }
 0x2f3   : > { %1126 = vmatpush.msra.mxu2 %v1009_v47  ;;  %v1014_v47 = vld [vmem:[%s2895_s10 + $0x180] sm:$0xff] }
 0x2f4   : > { %1146 = vmatpush.msra.mxu0 %v1010_v48  ;;  %1107 = vmatpush.msrb.mxu3 %v1001_v50  ;;  %v976_v48 = vld [vmem:[%s2895_s10 + $0x50] sm:$0xff]  ;;  %v1006_v50 = vld [vmem:[%s2895_s10 + $0x140] sm:$0xff] }
 0x2f5   : > { %1127 = vmatpush.msra.mxu2 %v1002_v51  ;;  %v1007_v51 = vld [vmem:[%s2895_s10 + $0x148] sm:$0xff] }
 0x2f6   : > { %1147 = vmatpush.msra.mxu0 %v1003_v52  ;;  %v969_v52 = vld [vmem:[%s2895_s10 + $0x18] sm:$0xff] }
 0x370   : > { %v848_v54 = vpop.f32.mrf.mxu3 }
 0x371   : > { %v849_v55 = vadd.f32 %v848_v54, %v830_v53  ;;  %v1046_v53 = vld [vmem:[%s2895_s10 + $0x280] sm:$0xff] }
 0x372   : > { %v994_v54 = vld [vmem:[%s2895_s10 + $0xe0] sm:$0xff]  ;;  %1161 = vmatpush.msra.mxu1 %v1046_v53 }
 0x373   : > { %v851_v56 = vmax.f32 %v849_v55, 0.0  ;;  %v995_v55 = vld [vmem:[%s2895_s10 + $0xe8] sm:$0xff]  ;;  %1108 = vmatpush.msrb.mxu3 %v994_v54  ;;  %v998_v53 = vld [vmem:[%s2895_s10 + $0x100] sm:$0xff] }
 0x374   : > { %1128 = vmatpush.msra.mxu2 %v995_v55  ;;  %1162 = vmatpush.msra.mxu1 %v1039_v57  ;;  %v999_v54 = vld [vmem:[%s2895_s10 + $0x108] sm:$0xff]  ;;  %v1000_v55 = vld [vmem:[%s2895_s10 + $0x110] sm:$0xff] }
 0x375   : > { %885 = vmatmul.f32.vlgmr.msrb.gmra.mxu2 %v851_v56  ;;  %v996_v56 = vld [vmem:[%s2895_s10 + $0xf0] sm:$0xff]  ;;  %1109 = vmatpush.msrb.mxu3 %v987_v58  ;;  %v993_v58 = vld [vmem:[%s2895_s10 + $0xd8] sm:$0xff] }
 0x376   : > { %1148 = vmatpush.msra.mxu0 %v996_v56  ;;  %1129 = vmatpush.msra.mxu2 %v988_v59  ;;  %v991_v56 = vld [vmem:[%s2895_s10 + $0xc8] sm:$0xff]  ;;  %v992_v57 = vld [vmem:[%s2895_s10 + $0xd0] sm:$0xff] }
 0x377   : > { %1163 = vmatpush.msra.mxu1 %v1032_v61  ;;  %1110 = vmatpush.msrb.mxu3 %v980_v62  ;;  %v984_v59 = vld [vmem:[%s2895_s10 + $0x90] sm:$0xff]  ;;  %v986_v61 = vld [vmem:[%s2895_s10 + $0xa0] sm:$0xff]  ;;  %v977_v62 = vld [vmem:[%s2895_s10 + $0x58] sm:$0xff] }
 0x378   : > { %1149 = vmatpush.msra.mxu0 %v989_v60  ;;  %1130 = vmatpush.msra.mxu2 %v981_v63  ;;  %v985_v60 = vld [vmem:[%s2895_s10 + $0x98] sm:$0xff]  ;;  %v978_v63 = vld [vmem:[%s2895_s10 + $0x60] sm:$0xff] }
 0x379   : > { %1164 = vmatpush.msra.mxu1 %v1025_v2  ;;  %1111 = vmatpush.msrb.mxu3 %v973_v3  ;;  %v971_v2 = vld [vmem:[%s2895_s10 + $0x28] sm:$0xff]  ;;  %v972_v3 = vld [vmem:[%s2895_s10 + $0x30] sm:$0xff] }
 0x37a   : > { %1150 = vmatpush.msra.mxu0 %v982_v1  ;;  %1131 = vmatpush.msra.mxu2 %v974_v4  ;;  %v970_v1 = vld [vmem:[%s2895_s10 + $0x20] sm:$0xff]  ;;  %v944_v4 = vld [vmem:[%s2896_s11 + $0x38] ss:$0 sm:$0xff] }
 0x37b   : > { %1165 = vmatpush.msra.mxu1 %v1018_v7 }
 0x37c   : > { %1151 = vmatpush.msra.mxu0 %v975_v6 }
 0x37d   : > { %1166 = vmatpush.msra.mxu1 %v1011_v16 }
 0x37f   : > { %1167 = vmatpush.msra.mxu1 %v1004_v20 }
 0x381   : > { %1168 = vmatpush.msra.mxu1 %v997_v24 }
 0x383   : > { %1169 = vmatpush.msra.mxu1 %v990_v28 }
 0x385   : > { %1170 = vmatpush.msra.mxu1 %v983_v44 }
 0x387   : > { %1171 = vmatpush.msra.mxu1 %v976_v48 }
 0x389   : > { %1172 = vmatpush.msra.mxu1 %v969_v52 }
 0x3f8   : > { %v886_v10 = vpop.f32.mrf.mxu2 }
 0x3f9   : > { %v887_v11 = vadd.f32 %v886_v10, %v868_v9  ;;  %v966_v9 = vld [vmem:[%s2895_s10] sm:$0xff]  ;;  %v967_v10 = vld [vmem:[%s2895_s10 + $0x8] sm:$0xff] }
 0x3fa   : > { %1112 = vmatpush.msrb.mxu3 %v966_v9  ;;  %1132 = vmatpush.msra.mxu2 %v967_v10  ;;  %v1460_v9 = vld [vmem:[%s2896_s11 + $0x39] ss:$8 sm:$0x70] }
 0x3fb   : > { %v889_v12 = vmax.f32 %v887_v11, 0.0  ;;  %v968_v11 = vld [vmem:[%s2895_s10 + $0x10] sm:$0xff] }
 0x3fc   : > { %1152 = vmatpush.msra.mxu0 %v968_v11  ;;  %1177 = vmatpush.msra.mxu3 %v1075_v13 }
 0x3fd   : > { %923 = vmatmul.f32.vlgmr.msrb.gmra.mxu0 %v889_v12  ;;  %1197 = vmatpush.msrb.mxu2 %v1076_v14 }
 0x3fe   : > { %1217 = vmatpush.msrb.mxu0 %v1077_v15  ;;  %1178 = vmatpush.msra.mxu3 %v1068_v17 }
 0x3ff   : > { %1198 = vmatpush.msrb.mxu2 %v1069_v18 }
 0x400   : > { %1218 = vmatpush.msrb.mxu0 %v1070_v19  ;;  %1179 = vmatpush.msra.mxu3 %v1061_v21 }
 0x401   : > { %1199 = vmatpush.msrb.mxu2 %v1062_v22 }
 0x402   : > { %1219 = vmatpush.msrb.mxu0 %v1063_v23  ;;  %1180 = vmatpush.msra.mxu3 %v1054_v25 }
 0x403   : > { %1200 = vmatpush.msrb.mxu2 %v1055_v26 }
 0x404   : > { %1220 = vmatpush.msrb.mxu0 %v1056_v27  ;;  %1181 = vmatpush.msra.mxu3 %v1047_v29 }
 0x405   : > { %1201 = vmatpush.msrb.mxu2 %v1048_v30 }
 0x406   : > { %1221 = vmatpush.msrb.mxu0 %v1049_v31  ;;  %1182 = vmatpush.msra.mxu3 %v1040_v32 }
 0x407   : > { %1202 = vmatpush.msrb.mxu2 %v1041_v33 }
 0x408   : > { %1222 = vmatpush.msrb.mxu0 %v1042_v34  ;;  %1183 = vmatpush.msra.mxu3 %v1033_v35 }
 0x409   : > { %1203 = vmatpush.msrb.mxu2 %v1034_v36 }
 0x40a   : > { %1223 = vmatpush.msrb.mxu0 %v1035_v37  ;;  %1184 = vmatpush.msra.mxu3 %v1026_v38 }
 0x40b   : > { %1204 = vmatpush.msrb.mxu2 %v1027_v39 }
 0x40c   : > { %1224 = vmatpush.msrb.mxu0 %v1028_v40  ;;  %1185 = vmatpush.msra.mxu3 %v1019_v41 }
 0x40d   : > { %1205 = vmatpush.msrb.mxu2 %v1020_v42 }
 0x40e   : > { %1225 = vmatpush.msrb.mxu0 %v1021_v43  ;;  %1186 = vmatpush.msra.mxu3 %v1012_v45 }
 0x40f   : > { %1206 = vmatpush.msrb.mxu2 %v1013_v46 }
 0x410   : > { %1226 = vmatpush.msrb.mxu0 %v1014_v47  ;;  %1187 = vmatpush.msra.mxu3 %v1005_v49 }
 0x411   : > { %1207 = vmatpush.msrb.mxu2 %v1006_v50 }
 0x412   : > { %1227 = vmatpush.msrb.mxu0 %v1007_v51  ;;  %1188 = vmatpush.msra.mxu3 %v998_v53 }
 0x413   : > { %1208 = vmatpush.msrb.mxu2 %v999_v54 }
 0x414   : > { %1228 = vmatpush.msrb.mxu0 %v1000_v55  ;;  %1189 = vmatpush.msra.mxu3 %v991_v56 }
 0x415   : > { %1209 = vmatpush.msrb.mxu2 %v992_v57 }
 0x416   : > { %1229 = vmatpush.msrb.mxu0 %v993_v58  ;;  %1190 = vmatpush.msra.mxu3 %v984_v59 }
 0x417   : > { %1210 = vmatpush.msrb.mxu2 %v985_v60 }
 0x418   : > { %1230 = vmatpush.msrb.mxu0 %v986_v61  ;;  %1191 = vmatpush.msra.mxu3 %v977_v62 }
 0x419   : > { %1211 = vmatpush.msrb.mxu2 %v978_v63 }
 0x41a   : > { %1192 = vmatpush.msra.mxu3 %v970_v1 }
 0x41b   : > { %1212 = vmatpush.msrb.mxu2 %v971_v2 }
 0x47a   : > { %v924_v5 = vpop.f32.mrf.mxu0 }
 0x47b   : > { %v925_v8 = vadd.f32 %v924_v5, %v906_v0  ;;  %v979_v0 = vld [vmem:[%s2895_s10 + $0x68] sm:$0xff] }
 0x47c   : > { %1231 = vmatpush.msrb.mxu0 %v979_v0 }
 0x47d   : > { %v927_v12 = vmax.f32 %v925_v8, 0.0  ;;  %v1459_v8 = vld [vmem:[%s2896_s11 + $0x39] ss:$8 sm:$0xf] }
 0x47e   : > { %1232 = vmatpush.msrb.mxu0 %v972_v3  ;;  %v1081_v10 = vor.u32 %v1460_v9, %v1459_v8 }
 0x47f   : > { %961 = vmatmul.f32.vlgmr.msrb.gmra.mxu1 %v927_v12 }
 0x480   : > { %v1085_v11 = vperm.slane %v1081_v10, 2  ;;  %v1086_v12 = vperm.slane %v1081_v10, 3  ;;  %v1083_v17 = vperm.slane %v1081_v10, 0  ;;  %v1084_v18 = vperm.slane %v1081_v10, 1 }
 0x481   : > { %v1089_v23 = vperm.slane %v1081_v10, 6  ;;  %v1087_v34 = vperm.slane %v1081_v10, 4  ;;  %v1088_v35 = vperm.slane %v1081_v10, 5 }
 0x4fc   : > { %v962_v5 = vpop.f32.mrf.mxu1 }
 0x4fd   : > { %v963_v6 = vadd.f32 %v962_v5, %v944_v4 }
 0x4ff   : > { %v965_v7 = vmax.f32 %v963_v6, 0.0 }
 0x501   : > { %1113 = vmatmul.f32.vlgmr.msrb.gmra.mxu3 %v965_v7  ;;  %1133 = vmatmul.f32.vlgmr.msra.gmra.mxu2 %v965_v7 }
 0x502   : > { %1153 = vmatmul.f32.vlgmr.msra.gmra.mxu0 %v965_v7  ;;  %1173 = vmatmul.f32.vlgmr.msra.gmra.mxu1 %v965_v7 }
 0x509   : > { %1193 = vmatmul.f32.vlgmr.msra.gmra.mxu3 %v965_v7  ;;  %1213 = vmatmul.f32.vlgmr.msrb.gmra.mxu2 %v965_v7 }
 0x50a   : > { %1233 = vmatmul.f32.vlgmr.msrb.gmra.mxu0 %v965_v7 }
 0x57f   : > { %v1154_v13 = vpop.f32.mrf.mxu0  ;;  %v1174_v14 = vpop.f32.mrf.mxu1 }
 0x580   : > { %v1155_v15 = vadd.f32 %v1154_v13, %v1085_v11  ;;  %v1175_v16 = vadd.f32 %v1174_v14, %v1086_v12 }
 0x582   : > { %v1463_v19 = vmul.f32 -1.442695, %v1155_v15  ;;  %v1464_v20 = vmul.f32 -1.442695, %v1175_v16 }
 0x584   : > { %1513 = vpow2.f32 %v1463_v19  ;;  %v1114_v21 = vpop.f32.mrf.mxu3  ;;  %v1134_v22 = vpop.f32.mrf.mxu2 }
 0x585   : > { %1515 = vpow2.f32 %v1464_v20  ;;  %v1115_v24 = vadd.f32 %v1114_v21, %v1083_v17  ;;  %v1135_v25 = vadd.f32 %v1134_v22, %v1084_v18 }
 0x587   : > { %v1461_v26 = vmul.f32 -1.442695, %v1115_v24  ;;  %v1462_v27 = vmul.f32 -1.442695, %v1135_v25  ;;  %v1234_v28 = vpop.f32.mrf.mxu0 }
 0x588   : > { %v1235_v29 = vadd.f32 %v1234_v28, %v1089_v23 }
 0x589   : > { %1517 = vpow2.f32 %v1461_v26 }
 0x58a   : > { %v1514_v30 = vpop.eup %1513  ;;  %1519 = vpow2.f32 %v1462_v27  ;;  %v1467_v31 = vmul.f32 -1.442695, %v1235_v29 }
 0x58b   : > { %v1516_v32 = vpop.eup %1515  ;;  %v1260_v33 = vadd.f32 1.0, %v1514_v30 }
 0x58c   : > { %v1261_v36 = vadd.f32 1.0, %v1516_v32  ;;  %1521 = vpow2.f32 %v1467_v31  ;;  %v1194_v37 = vpop.f32.mrf.mxu3  ;;  %v1214_v38 = vpop.f32.mrf.mxu2 }
 0x58d   : > { %1523 = vrcp.f32 %v1260_v33  ;;  %v1195_v40 = vadd.f32 %v1194_v37, %v1087_v34  ;;  %v1215_v41 = vadd.f32 %v1214_v38, %v1088_v35  ;;  %v1304_v48 = vand.u32 2147483647, %v1260_v33 }
 0x58e   : > { %1525 = vrcp.f32 %v1261_v36  ;;  %v1306_v52 = vand.u32 2147483648, %v1260_v33  ;;  %vm1300_vm1 = vweird.f32 %v1260_v33  ;;  %v1319_v54 = vand.u32 2147483647, %v1261_v36 }
 0x58f   : > { %v1518_v39 = vpop.eup %1517  ;;  %v1465_v46 = vmul.f32 -1.442695, %v1195_v40  ;;  %v1466_v49 = vmul.f32 -1.442695, %v1215_v41  ;;  %v1321_v56 = vand.u32 2147483648, %v1261_v36  ;;  %vm2798_vm2 = vcmp.eq.f32.partialorder %v1304_v48, 8.507059e+37 }
 0x590   : > { %v1520_v42 = vpop.eup %1519  ;;  %v2785_v43 = vadd.f32 1.0, %v1518_v39  ;;  %vm1315_vm3 = vweird.f32 %v1261_v36  ;;  %v1307_v62 = vor.u32 1.1754944e-38, %v1306_v52  ;;  %vm2803_vm6 = vcmp.eq.f32.partialorder %v1319_v54, 8.507059e+37 }
 0x591   : > { %v2787_v44 = vadd.f32 1.0, %v1520_v42  ;;  %v1322_v4 = vor.u32 1.1754944e-38, %v1321_v56 }
 0x592   : > { %v1522_v45 = vpop.eup %1521  ;;  %1527 = vrcp.f32 %v2785_v43  ;;  %v1274_v5 = vand.u32 2147483647, %v2785_v43  ;;  %v1276_v9 = vand.u32 2147483648, %v2785_v43  ;;  %vm1270_vm11 = vweird.f32 %v2785_v43 }
 0x593   : > { %v1524_v47 = vpop.eup %1523  ;;  %1529 = vrcp.f32 %v2787_v44  ;;  %v2792_v57 = vadd.f32 1.0, %v1522_v45  ;;  %v1289_v10 = vand.u32 2147483647, %v2787_v44  ;;  %v1291_v14 = vand.u32 2147483648, %v2787_v44 }
 0x594   : > { %v1526_v50 = vpop.eup %1525  ;;  %v1296_v51 = vmul.f32 %v1524_v47, %v1260_v33  ;;  %1531 = vpow2.f32 %v1465_v46  ;;  %vm1301_vm4 = vweird.f32 %v1524_v47  ;;  %vm1275_vm13 = vcmp.eq.f32.partialorder %v1274_v5, 8.507059e+37 }
 0x595   : > { %v1311_v53 = vmul.f32 %v1526_v50, %v1261_v36  ;;  %1533 = vpow2.f32 %v1466_v49  ;;  %vm1316_vm5 = vweird.f32 %v1526_v50  ;;  %vm1302_vm7 = vmor %vm1300_vm1, %vm1301_vm4  ;;  %v1277_v26 = vor.u32 1.1754944e-38, %v1276_v9 }
 0x596   : > { %v1297_v55 = vsub.f32 1.0, %v1296_v51  ;;  %1535 = vrcp.f32 %v2792_v57  ;;  %vm1317_vm8 = vmor %vm1315_vm3, %vm1316_vm5  ;;  %vm1285_vm14 = vweird.f32 %v2787_v44  ;;  %v1292_v29 = vor.u32 1.1754944e-38, %v1291_v14 }
 0x597   : > { %v1312_v59 = vsub.f32 1.0, %v1311_v53  ;;  %vm1290_vm1 = vcmp.eq.f32.partialorder %v1289_v10, 8.507059e+37  ;;  %v1366_v33 = vand.u32 2147483648, %v2792_v57  ;;  %v1364_v36 = vand.u32 2147483647, %v2792_v57 }
 0x598   : > { %v1528_v60 = vpop.eup %1527  ;;  %v1298_v61 = vmul.f32 %v1524_v47, %v1297_v55  ;;  %vm1360_vm3 = vweird.f32 %v2792_v57 }
 0x599   : > { %v1530_v63 = vpop.eup %1529  ;;  %v1313_v0 = vmul.f32 %v1526_v50, %v1312_v59  ;;  %v1266_v2 = vmul.f32 %v1528_v60, %v2785_v43  ;;  %vm1271_vm9 = vweird.f32 %v1528_v60  ;;  %v1367_v39 = vor.u32 1.1754944e-38, %v1366_v33 }
 0x59a   : > { %v1299_v3 = vadd.f32 %v1524_v47, %v1298_v61  ;;  %v1281_v6 = vmul.f32 %v1530_v63, %v2787_v44  ;;  %v1532_v11 = vpop.eup %1531  ;;  %vm1286_vm10 = vweird.f32 %v1530_v63  ;;  %vm1272_vm12 = vmor %vm1270_vm11, %vm1271_vm9  ;;  %vm1365_vm5 = vcmp.eq.f32.partialorder %v1364_v36, 8.507059e+37 }
 0x59b   : > { %v1314_v7 = vadd.f32 %v1526_v50, %v1313_v0  ;;  %v1267_v8 = vsub.f32 1.0, %v1266_v2  ;;  %v1534_v15 = vpop.eup %1533  ;;  %v2817_v19 = vadd.f32 1.0, %v1532_v11  ;;  %vm1287_vm15 = vmor %vm1285_vm14, %vm1286_vm10 }
 0x59c   : > { %v1303_v12 = vsel %vm1302_vm7, %v1524_v47, %v1299_v3  ;;  %v1282_v13 = vsub.f32 1.0, %v1281_v6  ;;  %v1536_v20 = vpop.eup %1535  ;;  %v2825_v23 = vadd.f32 1.0, %v1534_v15 }
 0x59d   : > { %v1308_v16 = vsel %vm2798_vm2, %v1307_v62, %v1303_v12  ;;  %v1318_v17 = vsel %vm1317_vm8, %v1526_v50, %v1314_v7  ;;  %v1268_v18 = vmul.f32 %v1528_v60, %v1267_v8  ;;  %v1356_v25 = vmul.f32 %v1536_v20, %v2792_v57 }
 0x59e   : > { %1372 = vst [vmem:[%s2820_s20 + $0x10] sm:$0xff] %v1308_v16  ;;  %v1323_v21 = vsel %vm2803_vm6, %v1322_v4, %v1318_v17  ;;  %v1283_v22 = vmul.f32 %v1530_v63, %v1282_v13  ;;  %1537 = vrcp.f32 %v2817_v19  ;;  %vm1361_vm2 = vweird.f32 %v1536_v20 }
 0x59f   : > { %1373 = vst [vmem:[%s2820_s20 + $0x18] sm:$0xff] %v1323_v21  ;;  %v1269_v24 = vadd.f32 %v1528_v60, %v1268_v18  ;;  %v1357_v30 = vsub.f32 1.0, %v1356_v25  ;;  %1539 = vrcp.f32 %v2825_v23  ;;  %vm1362_vm4 = vmor %vm1360_vm3, %vm1361_vm2  ;;  %v1336_v46 = vand.u32 2147483648, %v2817_v19 }
 0x5a0   : > { %v1284_v27 = vadd.f32 %v1530_v63, %v1283_v22  ;;  %v1334_v48 = vand.u32 2147483647, %v2817_v19  ;;  %vm1330_vm7 = vweird.f32 %v2817_v19  ;;  %v1351_v50 = vand.u32 2147483648, %v2825_v23 }
 0x5a1   : > { %v1273_v28 = vsel %vm1272_vm12, %v1528_v60, %v1269_v24  ;;  %v1358_v35 = vmul.f32 %v1536_v20, %v1357_v30  ;;  %v1349_v53 = vand.u32 2147483647, %v2825_v23  ;;  %v1337_v54 = vor.u32 1.1754944e-38, %v1336_v46 }
 0x5a2   : > { %v1278_v31 = vsel %vm1275_vm13, %v1277_v26, %v1273_v28  ;;  %v1288_v32 = vsel %vm1287_vm15, %v1530_v63, %v1284_v27  ;;  %vm1335_vm9 = vcmp.eq.f32.partialorder %v1334_v48, 8.507059e+37  ;;  %vm1345_vm10 = vweird.f32 %v2825_v23 }
 0x5a3   : > { %1370 = vst [vmem:[%s2820_s20] sm:$0xff] %v1278_v31  ;;  %v1293_v34 = vsel %vm1290_vm1, %v1292_v29, %v1288_v32  ;;  %v1359_v38 = vadd.f32 %v1536_v20, %v1358_v35  ;;  %v1352_v58 = vor.u32 1.1754944e-38, %v1351_v50  ;;  %vm1350_vm12 = vcmp.eq.f32.partialorder %v1349_v53, 8.507059e+37 }
 0x5a4   : > { %1371 = vst [vmem:[%s2820_s20 + $0x8] sm:$0xff] %v1293_v34  ;;  %v1538_v37 = vpop.eup %1537 }
 0x5a5   : > { %v1326_v40 = vmul.f32 %v1538_v37, %v2817_v19  ;;  %v1540_v41 = vpop.eup %1539  ;;  %v1363_v42 = vsel %vm1362_vm4, %v1536_v20, %v1359_v38  ;;  %vm1331_vm6 = vweird.f32 %v1538_v37 }
 0x5a6   : > { %v1368_v43 = vsel %vm1365_vm5, %v1367_v39, %v1363_v42  ;;  %v1341_v45 = vmul.f32 %v1540_v41, %v2825_v23  ;;  %vm1346_vm8 = vweird.f32 %v1540_v41 }
 0x5a7   : > { %v1327_v44 = vsub.f32 1.0, %v1326_v40  ;;  %1376 = vst.msk [vmem:[%s2820_s20 + $0x30] sm:$0xff] %vm518_vm0, %v1368_v43  ;;  %vm1332_vm0 = vmor %vm1330_vm7, %vm1331_vm6 }
 0x5a8   : > { %v1342_v49 = vsub.f32 1.0, %v1341_v45  ;;  %vm1347_vm11 = vmor %vm1345_vm10, %vm1346_vm8 }
 0x5a9   : > { %v1328_v47 = vmul.f32 %v1538_v37, %v1327_v44 }
 0x5aa   : > { %v1343_v52 = vmul.f32 %v1540_v41, %v1342_v49 }
 0x5ab   : > { %v1329_v51 = vadd.f32 %v1538_v37, %v1328_v47 }
 0x5ac   : > { %v1344_v56 = vadd.f32 %v1540_v41, %v1343_v52 }
 0x5ad   : > { %v1333_v55 = vsel %vm1332_vm0, %v1538_v37, %v1329_v51 }
 0x5ae   : > { %v1338_v57 = vsel %vm1335_vm9, %v1337_v54, %v1333_v55  ;;  %v1348_v59 = vsel %vm1347_vm11, %v1540_v41, %v1344_v56 }
 0x5af   : > { %1374 = vst [vmem:[%s2820_s20 + $0x20] sm:$0xff] %v1338_v57  ;;  %v1353_v60 = vsel %vm1350_vm12, %v1352_v58, %v1348_v59 }
 0x5b0   : > { %1375 = vst [vmem:[%s2820_s20 + $0x28] sm:$0xff] %v1353_v60 }
 0x5b1   : > { %1568 = shalt.err (!%p1565_p3)
}
 0x5b2   : > { %1474 = dma.vmem_to_hbm [thread:$0]  (%p1708_p5), %s1392_s18, 896, %s1394_s29, %s1378_s23  }
 0x5b3 PF: > { %p1480_p4 = scmp.ge.s32.totalorder %s1603_s24, 2  ;;  %s1405_s17 = sand.u32 1, %s1591_s21  }
 0x5b4   : > { %s1406_s20 = scalar_lea.sflag [#allocation3], %s1405_s17 }
 0x5b5   : > { %p1477_p7 = pnand %p1480_p4, %p1712_p6 }
 0x5b7   : > { %p1478_p8 = pneg %p1477_p7 }
 0x5b9   : > { %1586 = dma.done.wait (%p1478_p8), %s1406_s20, 896  }
 0x5ba   : > { %1588 = vsyncadd (%p1478_p8), %s1406_s20, 4294966400  ;;  %s2910_s24 = sld [smem:[#allocation6_spill]]  ;;  %s2913_s21 = smov %s1595_s22 }
 0x5bb   : > { %s2911_s25 = sld [smem:[#allocation5_spill]] }
 0x5bc   : > { %s2912_s23 = sld [smem:[#allocation7_spill]] }
 0x5c0   : > { %p22_p9 = scmp.ge.s32.totalorder %s2910_s24, 4  }
 0x5c1   : > { %s2914_s22 = smov %s2911_s25 }
 0x5c2   :  { %24 = sbr.rel (!%p22_p9) target bundleno = 3 (0x3), region = 104 }
 0x5c7   :  { %1412 = vsyncpa [#allocation3], 1 }
 0x5c8   :  { %1414 = vsyncpa [#allocation3 + $0x1], 1 }

</bundles_post_ra>
